<compile_context>
chip_gen: v6e
topology: v6e:2x2x1
jax: 0.10.0
libtpu: 0.0.40
codegen_flags: <defaults>
</compile_context>

<pallas_src>
import jax
import jax.numpy as jnp
from jax import lax
from jax.experimental import pallas as pl
from jax.experimental.pallas import tpu as pltpu

MARGIN = 1.0           # CommunityPreservationLoss(margin=1.0)
ADJ_WEIGHT = 0.5       # TopoLossV2(adjacency_weight=0.5)
COMM_WEIGHT = 0.5      # TopoLossV2(community_weight=0.5)
EPS = 1e-12            # F.normalize eps
BIG = 1e30             # masked-min filler (avoid inf arithmetic)


def topo_loss_kernel(ne_blk_ref, ne_t_ref, e_blk_ref, e_t_ref,
                     sqn_row_ref, sqn_col_ref, adj_ref, crow_ref, ccol_ref,
                     out_ref):
    """One row block: rows [i*TM, (i+1)*TM) of the pairwise matrices."""
    TM = adj_ref.shape[0]

    adjf = adj_ref[...].astype(jnp.float32)                    # (TM, N) 0/1

    # ---- adjacency alignment: cosine-sim rows on the MXU (M,K)x(K,N) ----
    sim = lax.dot_general(ne_blk_ref[...], ne_t_ref[...],
                          (((1,), (0,)), ((), ())),
                          preferred_element_type=jnp.float32)  # (TM, N)
    s2 = sim * sim
    as2 = adjf * s2
    pos_cnt = jnp.sum(adjf)
    sum_s2 = jnp.sum(s2)
    sum_as2 = jnp.sum(as2)
    sum_asim = jnp.sum(adjf * sim)
    # sum(adj*(sim-1)^2) and sum((1-adj)*sim^2) without the extra (TM,N) ops
    pos_sum = sum_as2 - 2.0 * sum_asim + pos_cnt
    neg_sum = sum_s2 - sum_as2
    # (sim/s2/as2 now dead -> frees vregs before the distance section)

    # ---- pairwise Euclidean distance rows via the gram trick ----
    gram = lax.dot_general(e_blk_ref[...], e_t_ref[...],
                           (((1,), (0,)), ((), ())),
                           preferred_element_type=jnp.float32)  # (TM, N)
    dist = jnp.sqrt(jnp.maximum(
        sqn_col_ref[...] + sqn_row_ref[...] - 2.0 * gram, 0.0))

    # ---- community-preservation (vectorized triplet) partials ----
    same = ccol_ref[...] == crow_ref[...]                       # (TM, N) bool
    same_f = same.astype(jnp.float32)

    # min distance from each row-node to any node in a *different* community
    min_neg = jnp.min(jnp.where(same, BIG, dist), axis=1, keepdims=True)
    thr = min_neg - MARGIN                                      # fold margin

    hinge_sum = jnp.sum(jnp.where(same, jnp.maximum(dist - thr, 0.0), 0.0))
    # diagonal pairs (i,i) are always inside `same`; dist_ii ~ 0, so their
    # contribution is max(MARGIN - min_neg, 0) per row -> subtract it and
    # subtract TM from the pair count (no (TM,N) iota / diag mask needed).
    diag_corr = jnp.sum(jnp.maximum(MARGIN - min_neg, 0.0))
    trip_sum = hinge_sum - diag_corr
    trip_cnt = jnp.sum(same_f) - TM

    # ---- lane-dense (8,128) partial tile: sublane k holds scalar k ----
    ridx = lax.broadcasted_iota(jnp.int32, (8, 128), 0)
    tile = jnp.where(ridx == 0, pos_sum,
           jnp.where(ridx == 1, neg_sum,
           jnp.where(ridx == 2, pos_cnt,
           jnp.where(ridx == 3, trip_sum,
           jnp.where(ridx == 4, trip_cnt, 0.0)))))
    out_ref[0] = tile


def _pick_tile_and_vmem(n, d):
    """Pick the row-block size TM and an explicit VMEM limit per generation.

    Per-step live set ~ 6 f32 (TM,N) temporaries + 2x int8 (TM,N) adjacency
    buffers + small (TM,D)/(TM,1) streams; residents are the (D,N) transposed
    embeddings plus O(N) rows.  v7x has 64 MiB VMEM/TC (vs 128 MiB v5e/v6e)
    and the scoped defaults are only 16/32 MiB, so size TM and raise the
    limit explicitly instead of relying on defaults.
    """
    try:
        cap = int(pltpu.get_tpu_info().vmem_capacity_bytes)
    except Exception:
        cap = 64 * 1024 * 1024              # conservative v7x per-TC floor
    budget = int(cap * 0.55)                # headroom for Mosaic scratch
    resident = 2 * (2 * d * n * 4) + 2 * (2 * n * 4) + (2 * n * 4)
    for tm in (128, 64, 32):                # int8 tiles want sublane %32 == 0
        if n % tm:
            continue
        streamed = 2 * tm * n + 4 * tm * d * 4 + 8 * tm * 4
        live = 6 * tm * n * 4
        if resident + streamed + live <= budget:
            need = resident + streamed + live + (8 << 20)
            return tm, int(min(cap - (6 << 20), max(need, 32 << 20)))
    # Fall back to the smallest legal tile (or one full-extent block).
    tm = 32 if (n % 32 == 0) else n
    return tm, int(cap * 0.85)


def topo_loss_v2(embeddings, adjacency, communities):
    """embeddings: (N, D), adjacency: (N, N), communities: (N,) int."""
    e = embeddings.astype(jnp.float32)
    N, D = e.shape

    # Cheap O(N*D) / O(N^2-bitmask) preprocessing hoisted out of the kernel.
    sq_norms = jnp.sum(e * e, axis=1)                          # (N,)
    ne = e / jnp.maximum(jnp.sqrt(sq_norms), EPS)[:, None]     # F.normalize
    ne_t = ne.T                                                # (D, N) MXU RHS
    e_t = e.T                                                  # (D, N) MXU RHS
    sqn_row = sq_norms.reshape(1, N)
    sqn_col = sq_norms.reshape(N, 1)
    adj_mask = (adjacency > 0).astype(jnp.int8)                # 4x fewer HBM bytes
    comm = communities.astype(jnp.int32)
    comm_row = comm.reshape(1, N)
    comm_col = comm.reshape(N, 1)

    TM, vmem_limit = _pick_tile_and_vmem(N, D)
    G = N // TM

    partials = pl.pallas_call(
        topo_loss_kernel,
        out_shape=jax.ShapeDtypeStruct((G, 8, 128), jnp.float32),
        grid=(G,),
        in_specs=[
            pl.BlockSpec((TM, D), lambda i: (i, 0)),   # ne row block (streamed LHS)
            pl.BlockSpec((D, N), lambda i: (0, 0)),    # ne^T (resident RHS)
            pl.BlockSpec((TM, D), lambda i: (i, 0)),   # e row block (streamed LHS)
            pl.BlockSpec((D, N), lambda i: (0, 0)),    # e^T (resident RHS)
            pl.BlockSpec((1, N), lambda i: (0, 0)),    # squared norms row (resident)
            pl.BlockSpec((TM, 1), lambda i: (i, 0)),   # squared norms column block
            pl.BlockSpec((TM, N), lambda i: (i, 0)),   # int8 adjacency (streamed)
            pl.BlockSpec((1, N), lambda i: (0, 0)),    # communities row (resident)
            pl.BlockSpec((TM, 1), lambda i: (i, 0)),   # communities column block
        ],
        out_specs=pl.BlockSpec((1, 8, 128), lambda i: (i, 0, 0)),
        compiler_params=pltpu.CompilerParams(
            dimension_semantics=("parallel",),          # shard blocks across TCs
            vmem_limit_bytes=vmem_limit),
        cost_estimate=pl.CostEstimate(
            flops=4 * N * N * D + 16 * N * N,
            transcendentals=N * N,
            bytes_accessed=N * N + 16 * N * D + 32 * N),
    )(ne, ne_t, e, e_t, sqn_row, sqn_col, adj_mask, comm_row, comm_col)

    # O(G) scalar combine in plain JAX (per-block partials -> final loss).
    sums = jnp.sum(partials[:, :5, 0], axis=0)
    pos_sum, neg_sum, pos_cnt, trip_sum, trip_cnt = (sums[k] for k in range(5))
    neg_cnt = jnp.float32(N * N) - pos_cnt
    # NOTE: pos_cnt == 0 or neg_cnt == 0 gives NaN/inf, same as the reference.
    adjacency_loss = pos_sum / pos_cnt + neg_sum / neg_cnt

    has_multi = jnp.any(comm != comm[0])
    valid = jnp.logical_and(has_multi, trip_cnt > 0.5)
    comm_loss = jnp.where(valid, trip_sum / jnp.maximum(trip_cnt, 1.0), 0.0)

    return ADJ_WEIGHT * adjacency_loss + COMM_WEIGHT * comm_loss


def topo_loss_v2_ref(embeddings, adjacency, communities):
    """Pure-JAX reference (mirrors the PyTorch forward, vectorized)."""
    e = embeddings.astype(jnp.float32)
    N = e.shape[0]
    norms = jnp.maximum(jnp.linalg.norm(e, axis=1, keepdims=True), EPS)
    ne = e / norms
    sim = ne @ ne.T
    adj_mask = adjacency > 0
    pos_loss = jnp.sum(jnp.where(adj_mask, (sim - 1.0) ** 2, 0.0)) / jnp.sum(adj_mask)
    neg_loss = jnp.sum(jnp.where(adj_mask, 0.0, sim ** 2)) / jnp.sum(~adj_mask)
    adjacency_loss = pos_loss + neg_loss

    diff = e[:, None, :] - e[None, :, :]
    dist = jnp.sqrt(jnp.maximum(jnp.sum(diff * diff, axis=-1), 0.0))
    same = communities[:, None] == communities[None, :]
    not_diag = ~jnp.eye(N, dtype=bool)
    min_neg = jnp.min(jnp.where(same, BIG, dist), axis=1, keepdims=True)
    pair_mask = same & not_diag
    triplet = jnp.maximum(dist - min_neg + MARGIN, 0.0)
    trip_sum = jnp.sum(jnp.where(pair_mask, triplet, 0.0))
    trip_cnt = jnp.sum(pair_mask)
    has_multi = jnp.any(communities != communities[0])
    comm_loss = jnp.where(has_multi & (trip_cnt > 0),
                          trip_sum / jnp.maximum(trip_cnt, 1), 0.0)
    return ADJ_WEIGHT * adjacency_loss + COMM_WEIGHT * comm_loss


if __name__ == "__main__":
    key = jax.random.PRNGKey(0)
    k_emb, k_adj, k_comm = jax.random.split(key, 3)

    N, D = 256, 32  # num_nodes, embed_dim (TM=128 -> 2 row blocks)
    embeddings = jax.random.normal(k_emb, (N, D), dtype=jnp.float32)
    adjacency = (jax.random.uniform(k_adj, (N, N)) > 0.7).astype(jnp.float32)
    communities = jax.random.randint(k_comm, (N,), 0, 8, dtype=jnp.int32)

    loss = jax.block_until_ready(topo_loss_v2(embeddings, adjacency, communities))
    ref = jax.block_until_ready(topo_loss_v2_ref(embeddings, adjacency, communities))
    assert jnp.allclose(loss, ref, rtol=5e-4, atol=5e-4), (loss, ref)

    print("KERNEL_OK")
</pallas_src>

<mosaic_0001>
module attributes {stable_mosaic.version = 11 : i64} {
  func.func @topo_loss_kernel(%arg0: i32, %arg1: memref<128x32xf32, #tpu.memory_space<vmem>>, %arg2: memref<32x256xf32, #tpu.memory_space<vmem>>, %arg3: memref<128x32xf32, #tpu.memory_space<vmem>>, %arg4: memref<32x256xf32, #tpu.memory_space<vmem>>, %arg5: memref<1x256xf32, #tpu.memory_space<vmem>>, %arg6: memref<128x1xf32, #tpu.memory_space<vmem>>, %arg7: memref<128x256xi8, #tpu.memory_space<vmem>>, %arg8: memref<1x256xi32, #tpu.memory_space<vmem>>, %arg9: memref<128x1xi32, #tpu.memory_space<vmem>>, %arg10: memref<1x8x128xf32, #tpu.memory_space<vmem>>) attributes {dimension_semantics = [#tpu.dimension_semantics<parallel>], iteration_bounds = array<i64: 2>, scalar_prefetch = 0 : i64, scratch_operands = 0 : i64, tpu.core_type = #tpu.core_type<tc>, window_params = [{transform_indices = @transform_0, window_bounds = array<i64: 128, 32>}, {pipeline_mode = #tpu.pipeline_mode<synchronous>, transform_indices = @transform_1, window_bounds = array<i64: 32, 256>}, {transform_indices = @transform_2, window_bounds = array<i64: 128, 32>}, {pipeline_mode = #tpu.pipeline_mode<synchronous>, transform_indices = @transform_3, window_bounds = array<i64: 32, 256>}, {pipeline_mode = #tpu.pipeline_mode<synchronous>, transform_indices = @transform_4, window_bounds = array<i64: 1, 256>}, {transform_indices = @transform_5, window_bounds = array<i64: 128, 1>}, {transform_indices = @transform_6, window_bounds = array<i64: 128, 256>}, {pipeline_mode = #tpu.pipeline_mode<synchronous>, transform_indices = @transform_7, window_bounds = array<i64: 1, 256>}, {transform_indices = @transform_8, window_bounds = array<i64: 128, 1>}, {transform_indices = @transform_9, window_bounds = array<i64: 1, 8, 128>}]} {
    %c0 = arith.constant 0 : index
    %c0_0 = arith.constant 0 : index
    %0 = vector.load %arg7[%c0, %c0_0] : memref<128x256xi8, #tpu.memory_space<vmem>>, vector<128x256xi8>
    %1 = arith.sitofp %0 : vector<128x256xi8> to vector<128x256xf32>
    %c0_1 = arith.constant 0 : index
    %c0_2 = arith.constant 0 : index
    %2 = vector.load %arg1[%c0_1, %c0_2] : memref<128x32xf32, #tpu.memory_space<vmem>>, vector<128x32xf32>
    %c0_3 = arith.constant 0 : index
    %c0_4 = arith.constant 0 : index
    %3 = vector.load %arg2[%c0_3, %c0_4] : memref<32x256xf32, #tpu.memory_space<vmem>>, vector<32x256xf32>
    %cst = arith.constant dense<0.000000e+00> : vector<128x256xf32>
    %4 = tpu.matmul %2, %3, %cst {dimension_numbers = #tpu.dot_dimension_numbers<[1], [0], [0], [1], [0, 0, 1, 1], [], []>} : vector<128x32xf32>, vector<32x256xf32>, vector<128x256xf32> -> vector<128x256xf32>
    %5 = arith.mulf %4, %4 : vector<128x256xf32>
    %6 = arith.mulf %1, %5 : vector<128x256xf32>
    %7 = vector.shape_cast %1 : vector<128x256xf32> to vector<1x128x256xf32>
    %cst_5 = arith.constant dense<0.000000e+00> : vector<1xf32>
    %8 = vector.multi_reduction <add>, %7, %cst_5 [1, 2] : vector<1x128x256xf32> to vector<1xf32>
    %9 = vector.shape_cast %8 : vector<1xf32> to vector<1x1x1xf32>
    %10 = vector.extract %9[0, 0, 0] : f32 from vector<1x1x1xf32>
    %11 = vector.shape_cast %5 : vector<128x256xf32> to vector<1x128x256xf32>
    %cst_6 = arith.constant dense<0.000000e+00> : vector<1xf32>
    %12 = vector.multi_reduction <add>, %11, %cst_6 [1, 2] : vector<1x128x256xf32> to vector<1xf32>
    %13 = vector.shape_cast %12 : vector<1xf32> to vector<1x1x1xf32>
    %14 = vector.extract %13[0, 0, 0] : f32 from vector<1x1x1xf32>
    %15 = vector.shape_cast %6 : vector<128x256xf32> to vector<1x128x256xf32>
    %cst_7 = arith.constant dense<0.000000e+00> : vector<1xf32>
    %16 = vector.multi_reduction <add>, %15, %cst_7 [1, 2] : vector<1x128x256xf32> to vector<1xf32>
    %17 = vector.shape_cast %16 : vector<1xf32> to vector<1x1x1xf32>
    %18 = vector.extract %17[0, 0, 0] : f32 from vector<1x1x1xf32>
    %19 = arith.mulf %1, %4 : vector<128x256xf32>
    %20 = vector.shape_cast %19 : vector<128x256xf32> to vector<1x128x256xf32>
    %cst_8 = arith.constant dense<0.000000e+00> : vector<1xf32>
    %21 = vector.multi_reduction <add>, %20, %cst_8 [1, 2] : vector<1x128x256xf32> to vector<1xf32>
    %22 = vector.shape_cast %21 : vector<1xf32> to vector<1x1x1xf32>
    %23 = vector.extract %22[0, 0, 0] : f32 from vector<1x1x1xf32>
    %cst_9 = arith.constant 2.000000e+00 : f32
    %24 = arith.mulf %cst_9, %23 : f32
    %25 = arith.subf %18, %24 : f32
    %26 = arith.addf %25, %10 : f32
    %27 = arith.subf %14, %18 : f32
    %c0_10 = arith.constant 0 : index
    %c0_11 = arith.constant 0 : index
    %28 = vector.load %arg3[%c0_10, %c0_11] : memref<128x32xf32, #tpu.memory_space<vmem>>, vector<128x32xf32>
    %c0_12 = arith.constant 0 : index
    %c0_13 = arith.constant 0 : index
    %29 = vector.load %arg4[%c0_12, %c0_13] : memref<32x256xf32, #tpu.memory_space<vmem>>, vector<32x256xf32>
    %cst_14 = arith.constant dense<0.000000e+00> : vector<128x256xf32>
    %30 = tpu.matmul %28, %29, %cst_14 {dimension_numbers = #tpu.dot_dimension_numbers<[1], [0], [0], [1], [0, 0, 1, 1], [], []>} : vector<128x32xf32>, vector<32x256xf32>, vector<128x256xf32> -> vector<128x256xf32>
    %c0_15 = arith.constant 0 : index
    %c0_16 = arith.constant 0 : index
    %31 = vector.load %arg6[%c0_15, %c0_16] : memref<128x1xf32, #tpu.memory_space<vmem>>, vector<128x1xf32>
    %c0_17 = arith.constant 0 : index
    %c0_18 = arith.constant 0 : index
    %32 = vector.load %arg5[%c0_17, %c0_18] : memref<1x256xf32, #tpu.memory_space<vmem>>, vector<1x256xf32>
    %33 = vector.broadcast %31 : vector<128x1xf32> to vector<128x256xf32>
    %34 = vector.broadcast %32 : vector<1x256xf32> to vector<128x256xf32>
    %35 = arith.addf %33, %34 : vector<128x256xf32>
    %cst_19 = arith.constant 2.000000e+00 : f32
    %36 = vector.broadcast %cst_19 : f32 to vector<128x256xf32>
    %37 = arith.mulf %36, %30 : vector<128x256xf32>
    %38 = arith.subf %35, %37 : vector<128x256xf32>
    %cst_20 = arith.constant 0.000000e+00 : f32
    %39 = vector.broadcast %cst_20 : f32 to vector<128x256xf32>
    %40 = arith.maximumf %38, %39 : vector<128x256xf32>
    %41 = math.sqrt %40 : vector<128x256xf32>
    %c0_21 = arith.constant 0 : index
    %c0_22 = arith.constant 0 : index
    %42 = vector.load %arg9[%c0_21, %c0_22] : memref<128x1xi32, #tpu.memory_space<vmem>>, vector<128x1xi32>
    %c0_23 = arith.constant 0 : index
    %c0_24 = arith.constant 0 : index
    %43 = vector.load %arg8[%c0_23, %c0_24] : memref<1x256xi32, #tpu.memory_space<vmem>>, vector<1x256xi32>
    %44 = vector.broadcast %42 : vector<128x1xi32> to vector<128x256xi32>
    %45 = vector.broadcast %43 : vector<1x256xi32> to vector<128x256xi32>
    %46 = arith.cmpi eq, %44, %45 : vector<128x256xi32>
    %47 = arith.extui %46 : vector<128x256xi1> to vector<128x256xi32>
    %48 = arith.sitofp %47 : vector<128x256xi32> to vector<128x256xf32>
    %cst_25 = arith.constant 1.000000e+30 : f32
    %49 = vector.broadcast %cst_25 : f32 to vector<128x256xf32>
    %50 = arith.select %46, %49, %41 : vector<128x256xi1>, vector<128x256xf32>
    %cst_26 = arith.constant dense<0x7F800000> : vector<128xf32>
    %51 = vector.multi_reduction <minimumf>, %50, %cst_26 [1] : vector<128x256xf32> to vector<128xf32>
    %52 = vector.shape_cast %51 : vector<128xf32> to vector<128x1xf32>
    %cst_27 = arith.constant 1.000000e+00 : f32
    %53 = vector.broadcast %cst_27 : f32 to vector<128x1xf32>
    %54 = arith.subf %52, %53 : vector<128x1xf32>
    %55 = vector.broadcast %54 : vector<128x1xf32> to vector<128x256xf32>
    %56 = arith.subf %41, %55 : vector<128x256xf32>
    %cst_28 = arith.constant 0.000000e+00 : f32
    %57 = vector.broadcast %cst_28 : f32 to vector<128x256xf32>
    %58 = arith.maximumf %56, %57 : vector<128x256xf32>
    %cst_29 = arith.constant 0.000000e+00 : f32
    %59 = vector.broadcast %cst_29 : f32 to vector<128x256xf32>
    %60 = arith.select %46, %58, %59 : vector<128x256xi1>, vector<128x256xf32>
    %61 = vector.shape_cast %60 : vector<128x256xf32> to vector<1x128x256xf32>
    %cst_30 = arith.constant dense<0.000000e+00> : vector<1xf32>
    %62 = vector.multi_reduction <add>, %61, %cst_30 [1, 2] : vector<1x128x256xf32> to vector<1xf32>
    %63 = vector.shape_cast %62 : vector<1xf32> to vector<1x1x1xf32>
    %64 = vector.extract %63[0, 0, 0] : f32 from vector<1x1x1xf32>
    %cst_31 = arith.constant 1.000000e+00 : f32
    %65 = vector.broadcast %cst_31 : f32 to vector<128x1xf32>
    %66 = arith.subf %65, %52 : vector<128x1xf32>
    %cst_32 = arith.constant 0.000000e+00 : f32
    %67 = vector.broadcast %cst_32 : f32 to vector<128x1xf32>
    %68 = arith.maximumf %66, %67 : vector<128x1xf32>
    %69 = vector.shape_cast %68 : vector<128x1xf32> to vector<1x128x1xf32>
    %cst_33 = arith.constant dense<0.000000e+00> : vector<1xf32>
    %70 = vector.multi_reduction <add>, %69, %cst_33 [1, 2] : vector<1x128x1xf32> to vector<1xf32>
    %71 = vector.shape_cast %70 : vector<1xf32> to vector<1x1x1xf32>
    %72 = vector.extract %71[0, 0, 0] : f32 from vector<1x1x1xf32>
    %73 = arith.subf %64, %72 : f32
    %74 = vector.shape_cast %48 : vector<128x256xf32> to vector<1x128x256xf32>
    %cst_34 = arith.constant dense<0.000000e+00> : vector<1xf32>
    %75 = vector.multi_reduction <add>, %74, %cst_34 [1, 2] : vector<1x128x256xf32> to vector<1xf32>
    %76 = vector.shape_cast %75 : vector<1xf32> to vector<1x1x1xf32>
    %77 = vector.extract %76[0, 0, 0] : f32 from vector<1x1x1xf32>
    %cst_35 = arith.constant 1.280000e+02 : f32
    %78 = arith.subf %77, %cst_35 : f32
    %79 = tpu.iota {dimensions = array<i32: 0>} : vector<8x128xi32>
    %c0_i32 = arith.constant 0 : i32
    %80 = vector.broadcast %c0_i32 : i32 to vector<8x128xi32>
    %81 = arith.cmpi eq, %79, %80 : vector<8x128xi32>
    %c1_i32 = arith.constant 1 : i32
    %82 = vector.broadcast %c1_i32 : i32 to vector<8x128xi32>
    %83 = arith.cmpi eq, %79, %82 : vector<8x128xi32>
    %c2_i32 = arith.constant 2 : i32
    %84 = vector.broadcast %c2_i32 : i32 to vector<8x128xi32>
    %85 = arith.cmpi eq, %79, %84 : vector<8x128xi32>
    %c3_i32 = arith.constant 3 : i32
    %86 = vector.broadcast %c3_i32 : i32 to vector<8x128xi32>
    %87 = arith.cmpi eq, %79, %86 : vector<8x128xi32>
    %c4_i32 = arith.constant 4 : i32
    %88 = vector.broadcast %c4_i32 : i32 to vector<8x128xi32>
    %89 = arith.cmpi eq, %79, %88 : vector<8x128xi32>
    %cst_36 = arith.constant 0.000000e+00 : f32
    %90 = vector.broadcast %78 : f32 to vector<8x128xf32>
    %91 = vector.broadcast %cst_36 : f32 to vector<8x128xf32>
    %92 = arith.select %89, %90, %91 : vector<8x128xi1>, vector<8x128xf32>
    %93 = vector.broadcast %73 : f32 to vector<8x128xf32>
    %94 = arith.select %87, %93, %92 : vector<8x128xi1>, vector<8x128xf32>
    %95 = vector.broadcast %10 : f32 to vector<8x128xf32>
    %96 = arith.select %85, %95, %94 : vector<8x128xi1>, vector<8x128xf32>
    %97 = vector.broadcast %27 : f32 to vector<8x128xf32>
    %98 = arith.select %83, %97, %96 : vector<8x128xi1>, vector<8x128xf32>
    %99 = vector.broadcast %26 : f32 to vector<8x128xf32>
    %100 = arith.select %81, %99, %98 : vector<8x128xi1>, vector<8x128xf32>
    %c0_37 = arith.constant 0 : index
    %c0_38 = arith.constant 0 : index
    %c0_39 = arith.constant 0 : index
    %101 = vector.load %arg10[%c0_37, %c0_38, %c0_39] : memref<1x8x128xf32, #tpu.memory_space<vmem>>, vector<1x8x128xf32>
    %102 = vector.shape_cast %101 : vector<1x8x128xf32> to vector<8x128xf32>
    %103 = vector.shape_cast %100 : vector<8x128xf32> to vector<1x8x128xf32>
    tpu.vector_store %arg10[%c0_37, %c0_38, %c0_39], %103 {strides = array<i32>} : memref<1x8x128xf32, #tpu.memory_space<vmem>>, vector<1x8x128xf32>,
    return
  }
  func.func @transform_0(%arg0: i32) -> (i32, i32) {
    %c0_i32 = arith.constant 0 : i32
    %c0_i32_0 = arith.constant 0 : i32
    return %arg0, %c0_i32 : i32, i32
  }
  func.func @transform_1(%arg0: i32) -> (i32, i32) {
    %c0_i32 = arith.constant 0 : i32
    %c0_i32_0 = arith.constant 0 : i32
    %c0_i32_1 = arith.constant 0 : i32
    return %c0_i32, %c0_i32_0 : i32, i32
  }
  func.func @transform_2(%arg0: i32) -> (i32, i32) {
    %c0_i32 = arith.constant 0 : i32
    %c0_i32_0 = arith.constant 0 : i32
    return %arg0, %c0_i32 : i32, i32
  }
  func.func @transform_3(%arg0: i32) -> (i32, i32) {
    %c0_i32 = arith.constant 0 : i32
    %c0_i32_0 = arith.constant 0 : i32
    %c0_i32_1 = arith.constant 0 : i32
    return %c0_i32, %c0_i32_0 : i32, i32
  }
  func.func @transform_4(%arg0: i32) -> (i32, i32) {
    %c0_i32 = arith.constant 0 : i32
    %c0_i32_0 = arith.constant 0 : i32
    %c0_i32_1 = arith.constant 0 : i32
    return %c0_i32, %c0_i32_0 : i32, i32
  }
  func.func @transform_5(%arg0: i32) -> (i32, i32) {
    %c0_i32 = arith.constant 0 : i32
    %c0_i32_0 = arith.constant 0 : i32
    return %arg0, %c0_i32 : i32, i32
  }
  func.func @transform_6(%arg0: i32) -> (i32, i32) {
    %c0_i32 = arith.constant 0 : i32
    %c0_i32_0 = arith.constant 0 : i32
    return %arg0, %c0_i32 : i32, i32
  }
  func.func @transform_7(%arg0: i32) -> (i32, i32) {
    %c0_i32 = arith.constant 0 : i32
    %c0_i32_0 = arith.constant 0 : i32
    %c0_i32_1 = arith.constant 0 : i32
    return %c0_i32, %c0_i32_0 : i32, i32
  }
  func.func @transform_8(%arg0: i32) -> (i32, i32) {
    %c0_i32 = arith.constant 0 : i32
    %c0_i32_0 = arith.constant 0 : i32
    return %arg0, %c0_i32 : i32, i32
  }
  func.func @transform_9(%arg0: i32) -> (i32, i32, i32) {
    %c0_i32 = arith.constant 0 : i32
    %c0_i32_0 = arith.constant 0 : i32
    %c0_i32_1 = arith.constant 0 : i32
    return %arg0, %c0_i32, %c0_i32_0 : i32, i32, i32
  }
}

</mosaic_0001>

<bundles_post_ra>
// kernel: tpu_custom_call.1
= control target key start
LH: loop header
LB: loop body
LE: loop exit
PB: predicated region body
PF: predicated region fallthrough
CT: control target
= control target key end

     0   :  { %s4360_s0 = inlined_call_operand.vmem [shape: f32[256,32], index: 0, kind: input, shape index: {}]   ;;  %s4361_s1 = inlined_call_operand.vmem [shape: f32[32,256], index: 1, kind: input, shape index: {}]   ;;  %s4362_s2 = inlined_call_operand.vmem [shape: f32[256,32], index: 2, kind: input, shape index: {}]   ;;  %s4363_s3 = inlined_call_operand.vmem [shape: f32[32,256], index: 3, kind: input, shape index: {}]   ;;  %s4364_s4 = inlined_call_operand.vmem [shape: f32[1,256], index: 4, kind: input, shape index: {}]   ;;  %s4365_s5 = inlined_call_operand.vmem [shape: f32[256,1], index: 5, kind: input, shape index: {}]   ;;  %s4366_s6 = inlined_call_operand.vmem [shape: s8[256,256], index: 6, kind: input, shape index: {}]   ;;  %s4367_s7 = inlined_call_operand.vmem [shape: s32[1,256], index: 7, kind: input, shape index: {}]   ;;  %s4368_s8 = inlined_call_operand.vmem [shape: s32[256,1], index: 8, kind: input, shape index: {}]   ;;  %s4369_s9 = inlined_call_operand.hbm [shape: f32[2,8,128], index: 9, kind: output, shape index: {}]  }
   0x1   :  { %4442 = sst [smem:[#allocation47_spill]] %s4360_s0 }
   0x2   :  { %4443 = sst [smem:[#allocation48_spill]] %s4361_s1 }
   0x3   :  { %4444 = sst [smem:[#allocation49_spill]] %s4362_s2 }
   0x4   :  { %14 = vsyncpa [#allocation3], 0 }
   0x5   :  { %16 = vsyncpa [#allocation3 + $0x1], 0  ;;  %s2677_s30 = smov 0   ;;  %s2679_s10 = smov 0  }
   0x6   :  { %s2681_s11 = smov 0   ;;  %s2683_s12 = smov 0  }
   0x7 LB: > { %s2698_s13 = sadd.s32 4294967295, %s2622_s12   ;;  %s2338_s14 = sadd.s32 4294967294, %s2622_s12   ;;  %s2622_s12 = sphi %s2683_s12, %s4580_s12   ;;  %s2618_s11 = sphi %s2681_s11, %s4579_s11   ;;  %s2614_s10 = sphi %s2679_s10, %s4578_s10   ;;  %s2610_s30 = sphi %s2677_s30, %s4577_s30  }
   0x8   : > { %s2702_s15 = sadd.s32 1, %s2622_s12   ;;  %s243_s16 = sadd.s32 1, %s2618_s11 }
   0x9   : > { %s240_s17 = ssub.s32 %s2622_s12, %s2702_s15  ;;  %p253_p0 = scmp.ne.s32.totalorder %s2618_s11, %s2614_s10 }
   0xa   : > { %p241_p1 = scmp.eq.s32.totalorder %s240_s17, 0  ;;  %p254_p2 = scmp.eq.s32.totalorder %s2698_s13, 1 }
   0xb   : > { %p259_p3 = scmp.ne.s32.totalorder %s2614_s10, %s2610_s30  ;;  %p260_p4 = scmp.eq.s32.totalorder %s2338_s14, 1 }
   0xc   : > { %s2713_s18 = scalar_select %p241_p1, %s2618_s11, %s243_s16  }
   0xd   : > { %p2715_p5 = por %p254_p2, %p253_p0  ;;  %p2719_p6 = por %p260_p4, %p259_p3 }
   0xe   : > { %p2341_p7 = scmp.ge.s32.totalorder %s2622_s12, 1  ;;  %p336_p8 = scmp.lt.s32.totalorder %s2622_s12, 3 }
  0x10   : > { %p337_p9 = pnand %p2341_p7, %p336_p8 }
  0x12   : > { %340 = sbr.rel (%p337_p9) target bundleno = 712 (0x2c8), region = 56 }
  0x17   : > { %v1013_v0 = vld [vmem:[%s4363_s3 + $0x38] sm:$0xff]  ;;  %v1012_v1 = vld [vmem:[%s4363_s3 + $0x30] sm:$0xff]  ;;  %v1011_v2 = vld [vmem:[%s4363_s3 + $0x28] sm:$0xff]  ;;  %s2343_s27 = sshll.u32 %s2698_s13, 4  ;;  %v4370_v4 = vmov 0.0   ;;  %v2625_v6 = vmov 0  }
  0x18   : > { %1086 = vmatprep.subr.mxu1 %v1013_v0  ;;  %v1010_v3 = vld [vmem:[%s4363_s3 + $0x20] sm:$0xff]  ;;  %1126 = vmatprep.mubr.f32.mxu1 %v4370_v4  ;;  %p394_p10 = scmp.lt.s32.totalorder %s2343_s27, 31  ;;  %v1009_v5 = vld [vmem:[%s4363_s3 + $0x18] sm:$0xff]  ;;  %v1008_v7 = vld [vmem:[%s4363_s3 + $0x10] sm:$0xff]  ;;  %s4447_s2 = sld [smem:[#allocation49_spill]]  ;;  %vm520_vm0 = vcmask 261120  }
  0x19   : > { %1087 = vmatpush1.msra.mxu1 %v1012_v1  ;;  %2495 = vset.pattern.permute.xlu0 %v2625_v6  ;;  %v1007_v8 = vld [vmem:[%s4363_s3 + $0x8] sm:$0xff]  ;;  %v1006_v9 = vld [vmem:[%s4363_s3] sm:$0xff]  ;;  %s4448_s1 = sld [smem:[#allocation48_spill]] }
  0x1a   : > { %1088 = vmatprep.subr.mxu1 %v1011_v2  ;;  %s4582_s27 = smov (!%p394_p10, %s2343_s27), 31  ;;  %2496 = vset.pattern.permute.xlu1 %v2625_v6  ;;  %s4449_s0 = sld [smem:[#allocation47_spill]] }
  0x1b   : > { %1089 = vmatpush1.msra.mxu1 %v1010_v3  ;;  %633 = vmatprep.mubr.f32.mxu0 %v4370_v4  ;;  %s2752_s26 = sshll.u32 %s4582_s27, 3 }
  0x1c   : > { %1090 = vmatprep.subr.mxu1 %v1009_v5  ;;  %s2764_s21 = scalar_lea.vmem %s4365_s5, %s2752_s26  ;;  %s2783_s23 = scalar_lea.vmem %s4368_s8, %s2752_s26 }
  0x1d   : > { %1091 = vmatpush1.msra.mxu1 %v1008_v7  ;;  %v1223_v11 = vld [vmem:[%s2764_s21] sm:$0xff]  ;;  %v1225_v12 = vld [vmem:[%s2764_s21 + $0x10] sm:$0xff]  ;;  %v1224_v13 = vld [vmem:[%s2764_s21 + $0x8] sm:$0xff] }
  0x1e   : > { %s2758_s14 = scalar_lea.vmem %s4447_s2, %s2752_s26  ;;  %1092 = vmatprep.subr.mxu1 %v1007_v8  ;;  %1242 = vperm.xlu0 %2495, %v1223_v11   ;;  %v1226_v15 = vld [vmem:[%s2764_s21 + $0x18] sm:$0xff]  ;;  %v1227_v16 = vld [vmem:[%s2764_s21 + $0x20] sm:$0xff]  ;;  %v1228_v18 = vld [vmem:[%s2764_s21 + $0x28] sm:$0xff] }
  0x1f   : > { %v990_v10 = vld [vmem:[%s2758_s14] sm:$0xff]  ;;  %1093 = vmatpush1.msra.mxu1 %v1006_v9  ;;  %1252 = vperm.xlu1 %2496, %v1225_v12   ;;  %v991_v14 = vld [vmem:[%s2758_s14 + $0x8] sm:$0xff]  ;;  %v992_v17 = vld [vmem:[%s2758_s14 + $0x10] sm:$0xff] }
  0x20   : > { %2370 = vmatmul.mubr.msk.f32.vlgmr.msra.gmra.mxu1 %vm520_vm0, %v990_v10  ;;  %v1229_v19 = vld [vmem:[%s2764_s21 + $0x30] sm:$0xff]  ;;  %v993_v20 = vld [vmem:[%s2758_s14 + $0x18] sm:$0xff]  ;;  %v1683_v21 = vld [vmem:[%s2783_s23] sm:$0xff]  ;;  %s2827_s24 = scalar_lea.vmem %s4449_s0, %s2752_s26 }
  0x21   : > { %1132 = vmatprep.mubr.f32.mxu1 %v4370_v4  ;;  %v1684_v22 = vld [vmem:[%s2783_s23 + $0x8] sm:$0xff]  ;;  %v994_v23 = vld [vmem:[%s2758_s14 + $0x20] sm:$0xff]  ;;  %v1230_v24 = vld [vmem:[%s2764_s21 + $0x38] sm:$0xff] }
  0x22   : > { %1247 = vperm.xlu0 %2495, %v1224_v13   ;;  %v519_v25 = vld [vmem:[%s4448_s1 + $0x38] sm:$0xff]  ;;  %v518_v26 = vld [vmem:[%s4448_s1 + $0x30] sm:$0xff]  ;;  %v517_v27 = vld [vmem:[%s4448_s1 + $0x28] sm:$0xff] }
  0x23   : > { %1257 = vperm.xlu1 %2496, %v1226_v15   ;;  %593 = vmatprep.subr.mxu0 %v519_v25  ;;  %v1685_v28 = vld [vmem:[%s2783_s23 + $0x10] sm:$0xff]  ;;  %v516_v29 = vld [vmem:[%s4448_s1 + $0x20] sm:$0xff]  ;;  %v995_v30 = vld [vmem:[%s2758_s14 + $0x28] sm:$0xff] }
  0x24   : > { %2371 = vmatmul.mubr.msk.f32.gmra.mxu1 %vm520_vm0, %v991_v14  ;;  %v1231_v31 = vld [vmem:[%s2764_s21 + $0x40] sm:$0xff]  ;;  %594 = vmatpush1.msra.mxu0 %v518_v26  ;;  %v515_v32 = vld [vmem:[%s4448_s1 + $0x18] sm:$0xff]  ;;  %v514_v33 = vld [vmem:[%s4448_s1 + $0x10] sm:$0xff] }
  0x25   : > { %1138 = vmatprep.mubr.f32.mxu1 %v4370_v4  ;;  %595 = vmatprep.subr.mxu0 %v517_v27  ;;  %v1686_v34 = vld [vmem:[%s2783_s23 + $0x18] sm:$0xff]  ;;  %v513_v35 = vld [vmem:[%s4448_s1 + $0x8] sm:$0xff]  ;;  %v996_v36 = vld [vmem:[%s2758_s14 + $0x30] sm:$0xff] }
  0x26   : > { %1262 = vperm.xlu0 %2495, %v1227_v16   ;;  %596 = vmatpush1.msra.mxu0 %v516_v29  ;;  %v1232_v37 = vld [vmem:[%s2764_s21 + $0x48] sm:$0xff]  ;;  %v512_v38 = vld [vmem:[%s4448_s1] sm:$0xff]  ;;  %v997_v41 = vld [vmem:[%s2758_s14 + $0x38] sm:$0xff] }
  0x27   : > { %1267 = vperm.xlu1 %2496, %v1228_v18   ;;  %597 = vmatprep.subr.mxu0 %v515_v32  ;;  %v496_v39 = vld [vmem:[%s2827_s24] sm:$0xff]  ;;  %v1233_v42 = vld [vmem:[%s2764_s21 + $0x50] sm:$0xff]  ;;  %v497_v43 = vld [vmem:[%s2827_s24 + $0x8] sm:$0xff] }
  0x28   : > { %2372 = vmatmul.mubr.msk.f32.gmra.mxu1 %vm520_vm0, %v992_v17  ;;  %598 = vmatpush1.msra.mxu0 %v514_v33  ;;  %v1687_v40 = vld [vmem:[%s2783_s23 + $0x20] sm:$0xff]  ;;  %v1688_v44 = vld [vmem:[%s2783_s23 + $0x28] sm:$0xff]  ;;  %v1234_v46 = vld [vmem:[%s2764_s21 + $0x58] sm:$0xff] }
  0x29   : > { %1144 = vmatprep.mubr.f32.mxu1 %v4370_v4  ;;  %599 = vmatprep.subr.mxu0 %v513_v35  ;;  %v998_v45 = vld [vmem:[%s2758_s14 + $0x40] sm:$0xff]  ;;  %v498_v47 = vld [vmem:[%s2827_s24 + $0x10] sm:$0xff]  ;;  %v999_v49 = vld [vmem:[%s2758_s14 + $0x48] sm:$0xff] }
  0x2a   : > { %1272 = vperm.xlu0 %2495, %v1229_v19   ;;  %600 = vmatpush1.msra.mxu0 %v512_v38  ;;  %v1689_v48 = vld [vmem:[%s2783_s23 + $0x30] sm:$0xff]  ;;  %v1235_v50 = vld [vmem:[%s2764_s21 + $0x60] sm:$0xff]  ;;  %v499_v51 = vld [vmem:[%s2827_s24 + $0x18] sm:$0xff] }
  0x2b   : > { %1701 = vperm.xlu1 %2496, %v1683_v21   ;;  %2354 = vmatmul.mubr.msk.f32.vlgmr.msra.gmra.mxu0 %vm520_vm0, %v496_v39  ;;  %v1690_v52 = vld [vmem:[%s2783_s23 + $0x38] sm:$0xff]  ;;  %v1000_v53 = vld [vmem:[%s2758_s14 + $0x50] sm:$0xff]  ;;  %v1236_v54 = vld [vmem:[%s2764_s21 + $0x68] sm:$0xff] }
  0x2c   : > { %2373 = vmatmul.mubr.msk.f32.gmra.mxu1 %vm520_vm0, %v993_v20  ;;  %639 = vmatprep.mubr.f32.mxu0 %v4370_v4  ;;  %v500_v55 = vld [vmem:[%s2827_s24 + $0x20] sm:$0xff]  ;;  %v1001_v57 = vld [vmem:[%s2758_s14 + $0x58] sm:$0xff]  ;;  %v1237_v58 = vld [vmem:[%s2764_s21 + $0x70] sm:$0xff] }
  0x2d   : > { %1150 = vmatprep.mubr.f32.mxu1 %v4370_v4  ;;  %v1691_v56 = vld [vmem:[%s2783_s23 + $0x40] sm:$0xff]  ;;  %v501_v59 = vld [vmem:[%s2827_s24 + $0x28] sm:$0xff]  ;;  %v1238_v62 = vld [vmem:[%s2764_s21 + $0x78] sm:$0xff]  ;;  %s2349_s21 = sshll.u32 %s2698_s13, 2 }
  0x2e   : > { %1704 = vperm.xlu0 %2495, %v1684_v22   ;;  %v1692_v60 = vld [vmem:[%s2783_s23 + $0x48] sm:$0xff]  ;;  %v1002_v61 = vld [vmem:[%s2758_s14 + $0x60] sm:$0xff]  ;;  %v502_v63 = vld [vmem:[%s2827_s24 + $0x30] sm:$0xff]  ;;  %p412_p11 = scmp.lt.s32.totalorder %s2349_s21, 7 }
  0x2f   : > { %1277 = vperm.xlu1 %2496, %v1230_v24   ;;  %2355 = vmatmul.mubr.msk.f32.gmra.mxu0 %vm520_vm0, %v497_v43  ;;  %v1693_v0 = vld [vmem:[%s2783_s23 + $0x50] sm:$0xff]  ;;  %v1003_v1 = vld [vmem:[%s2758_s14 + $0x68] sm:$0xff]  ;;  %v1694_v2 = vld [vmem:[%s2783_s23 + $0x58] sm:$0xff]  ;;  %v1321_v24 = vlaneseq }
  0x30   : > { %2374 = vmatmul.mubr.msk.f32.gmra.mxu1 %vm520_vm0, %v994_v23  ;;  %645 = vmatprep.mubr.f32.mxu0 %v4370_v4  ;;  %v503_v3 = vld [vmem:[%s2827_s24 + $0x38] sm:$0xff]  ;;  %v1695_v5 = vld [vmem:[%s2783_s23 + $0x60] sm:$0xff]  ;;  %v1004_v6 = vld [vmem:[%s2758_s14 + $0x70] sm:$0xff]  ;;  %s4584_s21 = smov (!%p412_p11, %s2349_s21), 7 }
  0x31   : > { %1156 = vmatprep.mubr.f32.mxu1 %v4370_v4  ;;  %v1696_v7 = vld [vmem:[%s2783_s23 + $0x68] sm:$0xff]  ;;  %v504_v8 = vld [vmem:[%s2827_s24 + $0x40] sm:$0xff]  ;;  %v1697_v9 = vld [vmem:[%s2783_s23 + $0x70] sm:$0xff]  ;;  %v2940_v26 = vshrl.u32 %v1321_v24, 7 }
  0x32   : > { %1707 = vperm.xlu0 %2495, %v1685_v28   ;;  %v1005_v10 = vld [vmem:[%s2758_s14 + $0x78] sm:$0xff]  ;;  %v505_v12 = vld [vmem:[%s2827_s24 + $0x48] sm:$0xff]  ;;  %v506_v13 = vld [vmem:[%s2827_s24 + $0x50] sm:$0xff] }
  0x33   : > { %1282 = vperm.xlu1 %2496, %v1231_v31   ;;  %2356 = vmatmul.mubr.msk.f32.gmra.mxu0 %vm520_vm0, %v498_v47  ;;  %v1698_v11 = vld [vmem:[%s2783_s23 + $0x78] sm:$0xff]  ;;  %v508_v15 = vld [vmem:[%s2827_s24 + $0x60] sm:$0xff]  ;;  %v509_v16 = vld [vmem:[%s2827_s24 + $0x68] sm:$0xff]  ;;  %4451 = vst [vmem:[#allocation6_spill] sm:$0xff] %v2940_v26  ;;  %v1323_v29 = vsub.s32 0, %v2940_v26  ;;  %s2439_s23 = sshll.u32 %s4584_s21, 4 }
  0x34   : > { %2375 = vmatmul.mubr.msk.f32.gmra.mxu1 %vm520_vm0, %v995_v30  ;;  %651 = vmatprep.mubr.f32.mxu0 %v4370_v4  ;;  %v507_v14 = vld [vmem:[%s2827_s24 + $0x58] sm:$0xff]  ;;  %v510_v17 = vld [vmem:[%s2827_s24 + $0x70] sm:$0xff]  ;;  %v1327_v30 = vsub.s32 1, %v2940_v26  ;;  %v1699_v31 = vld [vmem:[%s4367_s7] sm:$0x3]  ;;  %s2981_s17 = scalar_lea.vmem %s4366_s6, %s2439_s23  ;;  %s390_s21 = sand.u32 1, %s2614_s10  }
  0x35   : > { %1162 = vmatprep.mubr.f32.mxu1 %v4370_v4  ;;  %v511_v18 = vld [vmem:[%s2827_s24 + $0x78] sm:$0xff]  ;;  %v2953_v33 = vrot.slane %v1699_v31, %v1323_v29  ;;  %s2342_s16 = sshll.u32 %s390_s21, 3 }
  0x36   : > { %1710 = vperm.xlu0 %2495, %v1686_v34   ;;  %v2955_v34 = vrot.slane %v1699_v31, %v1327_v30 }
  0x37   : > { %1287 = vperm.xlu1 %2496, %v1232_v37   ;;  %2357 = vmatmul.mubr.msk.f32.gmra.mxu0 %vm520_vm0, %v499_v51 }
  0x38   : > { %2376 = vmatmul.mubr.msk.f32.gmra.mxu1 %vm520_vm0, %v996_v36  ;;  %657 = vmatprep.mubr.f32.mxu0 %v4370_v4 }
  0x39   : > { %1168 = vmatprep.mubr.f32.mxu1 %v4370_v4 }
  0x3a   : > { %1713 = vperm.xlu0 %2495, %v1687_v40  }
  0x3b   : > { %1292 = vperm.xlu1 %2496, %v1233_v42   ;;  %2358 = vmatmul.mubr.msk.f32.gmra.mxu0 %vm520_vm0, %v500_v55 }
  0x3c   : > { %2377 = vmatmul.mubr.msk.f32.gmra.mxu1 %vm520_vm0, %v997_v41  ;;  %663 = vmatprep.mubr.f32.mxu0 %v4370_v4  ;;  %v2984_v41 = vld [vmem:[%s2981_s17] sm:$0xff] }
  0x3d   : > { %1174 = vmatprep.mubr.f32.mxu1 %v4370_v4  ;;  %v432_v43 = vunpack.c.0.s8 %v2984_v41 }
  0x3e   : > { %1716 = vperm.xlu0 %2495, %v1688_v44   ;;  %v2992_v44 = vld [vmem:[%s2981_s17 + $0x8] sm:$0xff] }
  0x3f   : > { %1297 = vperm.xlu1 %2496, %v1234_v46   ;;  %2359 = vmatmul.mubr.msk.f32.gmra.mxu0 %vm520_vm0, %v501_v59  ;;  %v3006_v51 = vcvt.s32.f32 %v432_v43 }
  0x40   : > { %2378 = vmatmul.mubr.msk.f32.gmra.mxu1 %vm520_vm0, %v998_v45  ;;  %669 = vmatprep.mubr.f32.mxu0 %v4370_v4 }
  0x41   : > { %1180 = vmatprep.mubr.f32.mxu1 %v4370_v4 }
  0x42   : > { %1719 = vperm.xlu0 %2495, %v1689_v48   ;;  %v433_v48 = vunpack.c.0.s8 %v2992_v44 }
  0x43   : > { %1302 = vperm.xlu1 %2496, %v1235_v50   ;;  %2360 = vmatmul.mubr.msk.f32.gmra.mxu0 %vm520_vm0, %v502_v63 }
  0x44   : > { %2379 = vmatmul.mubr.msk.f32.gmra.mxu1 %vm520_vm0, %v999_v49  ;;  %675 = vmatprep.mubr.f32.mxu0 %v4370_v4  ;;  %v434_v49 = vunpack.c.1.s8 %v2984_v41 }
  0x45   : > { %1186 = vmatprep.mubr.f32.mxu1 %v4370_v4 }
  0x46   : > { %1722 = vperm.xlu0 %2495, %v1690_v52   ;;  %v435_v52 = vunpack.c.1.s8 %v2992_v44 }
  0x47   : > { %1307 = vperm.xlu1 %2496, %v1236_v54   ;;  %2361 = vmatmul.mubr.msk.f32.gmra.mxu0 %vm520_vm0, %v503_v3  ;;  %v1239_v54 = vld [vmem:[%s4364_s4] sm:$0x3] }
  0x48   : > { %2380 = vmatmul.mubr.msk.f32.gmra.mxu1 %vm520_vm0, %v1000_v53  ;;  %681 = vmatprep.mubr.f32.mxu0 %v4370_v4  ;;  %v3011_v53 = vcvt.s32.f32 %v433_v48  ;;  %v3033_v63 = vrot.slane %v1239_v54, %v1327_v30 }
  0x49   : > { %1192 = vmatprep.mubr.f32.mxu1 %v4370_v4 }
  0x4a   : > { %1725 = vperm.xlu0 %2495, %v1691_v56   ;;  %v3016_v56 = vcvt.s32.f32 %v434_v49  ;;  %v794_v59 = vadd.f32 %v3011_v53, %v3006_v51 }
  0x4b   : > { %1312 = vperm.xlu1 %2496, %v1237_v58   ;;  %2362 = vmatmul.mubr.msk.f32.gmra.mxu0 %vm520_vm0, %v504_v8 }
  0x4c   : > { %2381 = vmatmul.mubr.msk.f32.gmra.mxu1 %vm520_vm0, %v1001_v57  ;;  %687 = vmatprep.mubr.f32.mxu0 %v4370_v4 }
  0x4d   : > { %1198 = vmatprep.mubr.f32.mxu1 %v4370_v4 }
  0x4e   : > { %1728 = vperm.xlu0 %2495, %v1692_v60   ;;  %v3028_v60 = vcvt.s32.f32 %v435_v52 }
  0x4f   : > { %1317 = vperm.xlu1 %2496, %v1238_v62   ;;  %2363 = vmatmul.mubr.msk.f32.gmra.mxu0 %vm520_vm0, %v505_v12  ;;  %v3031_v62 = vrot.slane %v1239_v54, %v1323_v29  ;;  %v438_v29 = vunpack.c.3.s8 %v2984_v41 }
  0x50   : > { %2382 = vmatmul.mubr.msk.f32.gmra.mxu1 %vm520_vm0, %v1002_v61  ;;  %693 = vmatprep.mubr.f32.mxu0 %v4370_v4  ;;  %v436_v61 = vunpack.c.2.s8 %v2984_v41 }
  0x51   : > { %1204 = vmatprep.mubr.f32.mxu1 %v4370_v4 }
  0x52   : > { %1731 = vperm.xlu0 %2495, %v1693_v0  }
  0x53   : > { %1734 = vperm.xlu1 %2496, %v1694_v2   ;;  %2364 = vmatmul.mubr.msk.f32.gmra.mxu0 %vm520_vm0, %v506_v13 }
  0x54   : > { %2383 = vmatmul.mubr.msk.f32.gmra.mxu1 %vm520_vm0, %v1003_v1  ;;  %699 = vmatprep.mubr.f32.mxu0 %v4370_v4  ;;  %v795_v1 = vadd.f32 %v794_v59, %v3016_v56 }
  0x55   : > { %1210 = vmatprep.mubr.f32.mxu1 %v4370_v4 }
  0x56   : > { %1737 = vperm.xlu0 %2495, %v1695_v5   ;;  %v796_v5 = vadd.f32 %v795_v1, %v3028_v60 }
  0x57   : > { %1740 = vperm.xlu1 %2496, %v1696_v7   ;;  %2365 = vmatmul.mubr.msk.f32.gmra.mxu0 %vm520_vm0, %v507_v14  ;;  %v437_v7 = vunpack.c.2.s8 %v2992_v44 }
  0x58   : > { %2384 = vmatmul.mubr.msk.f32.gmra.mxu1 %vm520_vm0, %v1004_v6  ;;  %705 = vmatprep.mubr.f32.mxu0 %v4370_v4  ;;  %v3045_v6 = vcvt.s32.f32 %v436_v61 }
  0x59   : > { %1216 = vmatprep.mubr.f32.mxu1 %v4370_v4  ;;  %v3089_v24 = vcvt.s32.f32 %v437_v7 }
  0x5a   : > { %1743 = vperm.xlu0 %2495, %v1697_v9  }
  0x5b   : > { %1746 = vperm.xlu1 %2496, %v1698_v11   ;;  %2366 = vmatmul.mubr.msk.f32.gmra.mxu0 %vm520_vm0, %v508_v15 }
  0x5c   : > { %2385 = vmatmul.mubr.msk.f32.gmra.mxu1 %vm520_vm0, %v1005_v10  ;;  %711 = vmatprep.mubr.f32.mxu0 %v4370_v4 }
  0x5f   : > { %2367 = vmatmul.mubr.msk.f32.gmra.mxu0 %vm520_vm0, %v509_v16 }
  0x60   : > { %717 = vmatprep.mubr.f32.mxu0 %v4370_v4 }
  0x63   : > { %2368 = vmatmul.mubr.msk.f32.gmra.mxu0 %vm520_vm0, %v510_v17 }
  0x64   : > { %723 = vmatprep.mubr.f32.mxu0 %v4370_v4 }
  0x67   : > { %2369 = vmatmul.mubr.msk.f32.gmra.mxu0 %vm520_vm0, %v511_v18 }
  0x99   : > { %v2932_v21 = vpop.permute.xlu0 %1242 }
  0x9a   : > { %v2928_v19 = vpop.permute.xlu1 %1252  ;;  %v1331_v8 = vadd.f32 %v3031_v62, %v2932_v21  ;;  %v1332_v9 = vadd.f32 %v3033_v63, %v2932_v21 }
  0x9b   : > { %v3054_v10 = vadd.f32 %v3031_v62, %v2928_v19  ;;  %v3058_v11 = vadd.f32 %v3033_v63, %v2928_v19 }
  0x9d   : > { %v2936_v23 = vpop.permute.xlu0 %1247 }
  0x9e   : > { %v2930_v20 = vpop.permute.xlu1 %1257  ;;  %v1333_v13 = vadd.f32 %v3031_v62, %v2936_v23  ;;  %v1334_v14 = vadd.f32 %v3033_v63, %v2936_v23 }
  0x9f   : > { %v3068_v15 = vadd.f32 %v3031_v62, %v2930_v20  ;;  %v3072_v17 = vadd.f32 %v3033_v63, %v2930_v20  ;;  %v797_v20 = vadd.f32 %v796_v5, %v3045_v6 }
  0xa1   : > { %v2942_v27 = vpop.permute.xlu0 %1262  ;;  %v798_v54 = vadd.f32 %v797_v20, %v3089_v24 }
  0xa2   : > { %v2934_v22 = vpop.permute.xlu1 %1267  ;;  %v3076_v18 = vadd.f32 %v3031_v62, %v2942_v27  ;;  %v3080_v19 = vadd.f32 %v3033_v63, %v2942_v27 }
  0xa3   : > { %v3094_v30 = vadd.f32 %v3031_v62, %v2934_v22  ;;  %v3098_v27 = vadd.f32 %v3033_v63, %v2934_v22 }
  0xa5   : > { %v2951_v32 = vpop.permute.xlu0 %1272 }
  0xa6   : > { %v2938_v25 = vpop.permute.xlu1 %1701  ;;  %v3102_v31 = vadd.f32 %v3031_v62, %v2951_v32 }
  0xa7   : > { %4450 = vst [vmem:[#allocation5_spill] sm:$0xff] %v2938_v25  ;;  %vm1756_vm1 = vcmp.eq.s32.totalorder %v2938_v25, %v2953_v33  ;;  %vm4420_vm2 = vcmp.eq.s32.totalorder %v2938_v25, %v2955_v34 }
  0xa8   : > { %v2386_v37 = vsel %vm1756_vm1, 1.0, %v4370_v4  ;;  %v2387_v38 = vsel %vm4420_vm2, 1.0, %v4370_v4 }
  0xa9   : > { %v2964_v36 = vpop.permute.xlu0 %1704  ;;  %v2158_v40 = vadd.f32 %v2387_v38, %v2386_v37  ;;  %v3106_v38 = vadd.f32 %v3033_v63, %v2951_v32 }
  0xaa   : > { %v2944_v28 = vpop.permute.xlu1 %1277  ;;  %4452 = vst [vmem:[#allocation7_spill] sm:$0xff] %v2964_v36  ;;  %vm4410_vm3 = vcmp.eq.s32.totalorder %v2964_v36, %v2953_v33  ;;  %vm4408_vm4 = vcmp.eq.s32.totalorder %v2964_v36, %v2955_v34 }
  0xab   : > { %v2388_v42 = vsel %vm4410_vm3, 1.0, %v4370_v4  ;;  %v2389_v50 = vsel %vm4408_vm4, 1.0, %v4370_v4  ;;  %v3114_v41 = vadd.f32 %v3033_v63, %v2944_v28 }
  0xac   : > { %v2159_v47 = vadd.f32 %v2388_v42, %v2158_v40  ;;  %v3110_v40 = vadd.f32 %v3031_v62, %v2944_v28 }
  0xad   : > { %v2996_v45 = vpop.permute.xlu0 %1707 }
  0xae   : > { %v2957_v35 = vpop.permute.xlu1 %1282  ;;  %4453 = vst [vmem:[#allocation8_spill] sm:$0xff] %v2996_v45  ;;  %vm4403_vm5 = vcmp.eq.s32.totalorder %v2996_v45, %v2953_v33  ;;  %v2160_v55 = vadd.f32 %v2389_v50, %v2159_v47  ;;  %vm4402_vm6 = vcmp.eq.s32.totalorder %v2996_v45, %v2955_v34 }
  0xaf   : > { %v2390_v57 = vsel %vm4403_vm5, 1.0, %v4370_v4  ;;  %v2391_v3 = vsel %vm4402_vm6, 1.0, %v4370_v4  ;;  %v3120_v47 = vadd.f32 %v3031_v62, %v2957_v35  ;;  %v3128_v28 = vadd.f32 %v3033_v63, %v2957_v35 }
  0xb0   : > { %v2161_v2 = vadd.f32 %v2390_v57, %v2160_v55  ;;  %v3131_v55 = vcvt.s32.f32 %v438_v29  ;;  %v439_v57 = vunpack.c.3.s8 %v2992_v44 }
  0xb1   : > { %v3035_v0 = vpop.permute.xlu0 %1710 }
  0xb2   : > { %v2974_v39 = vpop.permute.xlu1 %1287  ;;  %4454 = vst [vmem:[#allocation9_spill] sm:$0xff] %v3035_v0  ;;  %vm4377_vm7 = vcmp.eq.s32.totalorder %v3035_v0, %v2953_v33  ;;  %v2162_v16 = vadd.f32 %v2391_v3, %v2161_v2  ;;  %vm4376_vm8 = vcmp.eq.s32.totalorder %v3035_v0, %v2955_v34  ;;  %v426_v2 = vld [vmem:[%s2981_s17 + $0x10] sm:$0xff] }
  0xb3   : > { %v2392_v21 = vsel %vm4377_vm7, 1.0, %v4370_v4  ;;  %v2393_v32 = vsel %vm4376_vm8, 1.0, %v4370_v4  ;;  %v3143_v35 = vadd.f32 %v3031_v62, %v2974_v39  ;;  %v3147_v5 = vadd.f32 %v3033_v63, %v2974_v39 }
  0xb4   : > { %v2163_v42 = vadd.f32 %v2392_v21, %v2162_v16  ;;  %v799_v39 = vadd.f32 %v798_v54, %v3131_v55  ;;  %v440_v20 = vunpack.c.0.s8 %v426_v2 }
  0xb5   : > { %v3116_v22 = vpop.permute.xlu0 %1713 }
  0xb6   : > { %v2998_v46 = vpop.permute.xlu1 %1292  ;;  %4455 = vst [vmem:[#allocation10_spill] sm:$0xff] %v3116_v22  ;;  %vm4375_vm9 = vcmp.eq.s32.totalorder %v3116_v22, %v2953_v33  ;;  %v3139_v3 = vadd.f32 %v2393_v32, %v2163_v42  ;;  %vm4374_vm10 = vcmp.eq.s32.totalorder %v3116_v22, %v2955_v34 }
  0xb7   : > { %v3158_v16 = vsel %vm4375_vm9, 1.0, %v4370_v4  ;;  %v3174_v32 = vadd.f32 %v3031_v62, %v2998_v46 }
  0xb8   : > { %4456 = vst [vmem:[#allocation11_spill] sm:$0xff] %v3139_v3  ;;  %4457 = vst [vmem:[#allocation12_spill] sm:$0xff] %v3158_v16 }
  0xba   : > { %v3022_v58 = vpop.permute.xlu1 %1297 }
  0xbe   : > { %v3060_v12 = vpop.permute.xlu1 %1302 }
  0xc2   : > { %v1308_v48 = vpop.permute.xlu1 %1307 }
  0xc6   : > { %v1313_v29 = vpop.permute.xlu1 %1312 }
  0xe0   : > { %v1128_v23 = vpop.f32.mrf.mxu1 }
  0xe1   : > { %v1363_v37 = vmul.f32 2.0, %v1128_v23  ;;  %v3161_v23 = vcvt.s32.f32 %v439_v57 }
  0xe2   : > { %v1130_v43 = vpop.f32.mrf.mxu1 }
  0xe3   : > { %v1395_v49 = vsub.f32 %v1331_v8, %v1363_v37  ;;  %v1364_v50 = vmul.f32 2.0, %v1130_v43  ;;  %4458 = vst [vmem:[#allocation13_spill] sm:$0xff] %v3161_v23  ;;  %v3170_v43 = vsel %vm4374_vm10, 1.0, %v4370_v4  ;;  %v800_v2 = vadd.f32 %v799_v39, %v3161_v23 }
  0xe4   : > { %v1134_v52 = vpop.f32.mrf.mxu1  ;;  %4459 = vst [vmem:[#allocation14_spill] sm:$0xff] %v3170_v43  ;;  %v3214_v39 = vadd.f32 %v3031_v62, %v1313_v29 }
  0xe5   : > { %v3136_v59 = vmax.f32 %v1395_v49, 0.0  ;;  %v1396_v61 = vsub.f32 %v1332_v9, %v1364_v50  ;;  %v1365_v1 = vmul.f32 2.0, %v1134_v52  ;;  %v3178_v49 = vadd.f32 %v3033_v63, %v2998_v46 }
  0xe6   : > { %v1136_v44 = vpop.f32.mrf.mxu1  ;;  %v3182_v50 = vadd.f32 %v3031_v62, %v3022_v58  ;;  %v3194_v46 = vadd.f32 %v3031_v62, %v3060_v12 }
  0xe7   : > { %2497 = vrsqrt.f32 %v3136_v59  ;;  %v3152_v7 = vmax.f32 %v1396_v61, 0.0  ;;  %v1397_v8 = vsub.f32 %v1333_v13, %v1365_v1  ;;  %v1366_v9 = vmul.f32 2.0, %v1136_v44 }
  0xe8   : > { %v1140_v21 = vpop.f32.mrf.mxu1  ;;  %v3190_v61 = vadd.f32 %v3033_v63, %v3022_v58  ;;  %v3197_v44 = vcvt.s32.f32 %v440_v20  ;;  %v3205_v58 = vadd.f32 %v3033_v63, %v3060_v12  ;;  %v3221_v12 = vadd.f32 %v3033_v63, %v1313_v29 }
  0xe9   : > { %2499 = vrsqrt.f32 %v3152_v7  ;;  %v3164_v37 = vmax.f32 %v1397_v8, 0.0  ;;  %v1398_v42 = vsub.f32 %v1334_v14, %v1366_v9  ;;  %v1367_v13 = vmul.f32 2.0, %v1140_v21 }
  0xea   : > { %v1142_v14 = vpop.f32.mrf.mxu1  ;;  %4460 = vst [vmem:[#allocation15_spill] sm:$0xff] %v3197_v44  ;;  %v3208_v21 = vadd.f32 %v3031_v62, %v1308_v48  ;;  %v3230_v4 = vadd.f32 %v800_v2, %v3197_v44  ;;  %vm1461_vm11 = vcmp.eq.f32.partialorder %v3136_v59, inf  ;;  %vm1463_vm12 = vcmp.eq.f32.partialorder %v3136_v59, 0.0 }
  0xeb   : > { %2501 = vrsqrt.f32 %v3164_v37  ;;  %v3185_v52 = vmax.f32 %v1398_v42, 0.0  ;;  %v1399_v54 = vsub.f32 %v3054_v10, %v1367_v13  ;;  %v1368_v57 = vmul.f32 2.0, %v1142_v14  ;;  %v1318_v13 = vpop.permute.xlu1 %1317 }
  0xec   : > { %v1146_v1 = vpop.f32.mrf.mxu1  ;;  %v3211_v42 = vadd.f32 %v3033_v63, %v1308_v48  ;;  %v3227_v48 = vadd.f32 %v3033_v63, %v1318_v13  ;;  %4461 = vst [vmem:[#allocation16_spill] sm:$0xff] %v3230_v4  ;;  %vm1468_vm13 = vcmp.eq.f32.partialorder %v3152_v7, inf  ;;  %vm1470_vm14 = vcmp.eq.f32.partialorder %v3152_v7, 0.0 }
  0xed   : > { %2503 = vrsqrt.f32 %v3185_v52  ;;  %v3200_v8 = vmax.f32 %v1399_v54, 0.0  ;;  %v1400_v10 = vsub.f32 %v3058_v11, %v1368_v57  ;;  %v1369_v9 = vmul.f32 2.0, %v1146_v1 }
  0xee   : > { %v1148_v20 = vpop.f32.mrf.mxu1  ;;  %v3224_v57 = vadd.f32 %v3031_v62, %v1318_v13  ;;  %v1464_v62 = vand.u32 2147483648, %v3136_v59  ;;  %vm1475_vm15 = vcmp.eq.f32.partialorder %v3164_v37, inf  ;;  %v1478_v13 = vand.u32 2147483648, %v3164_v37 }
  0xef   : > { %2505 = vrsqrt.f32 %v3200_v8  ;;  %v3217_v14 = vmax.f32 %v1400_v10, 0.0  ;;  %v1401_v11 = vsub.f32 %v3068_v15, %v1369_v9  ;;  %v1370_v54 = vmul.f32 2.0, %v1148_v20 }
  0xf0   : > { %v1152_v1 = vpop.f32.mrf.mxu1  ;;  %v1471_v20 = vand.u32 2147483648, %v3152_v7  ;;  %vm1477_vm0 = vcmp.eq.f32.partialorder %v3164_v37, 0.0  ;;  %vm1482_vm10 = vcmp.eq.f32.partialorder %v3185_v52, inf  ;;  %vm1484_vm9 = vcmp.eq.f32.partialorder %v3185_v52, 0.0 }
  0xf1   : > { %v3232_v26 = vmax.f32 %v1401_v11, 0.0  ;;  %v1402_v10 = vsub.f32 %v3072_v17, %v1370_v54  ;;  %v1371_v43 = vmul.f32 2.0, %v1152_v1  ;;  %2507 = vrsqrt.f32 %v3217_v14 }
  0xf2   : > { %v1154_v15 = vpop.f32.mrf.mxu1  ;;  %vm1489_vm8 = vcmp.eq.f32.partialorder %v3200_v8, inf  ;;  %vm1491_vm7 = vcmp.eq.f32.partialorder %v3200_v8, 0.0 }
  0xf3   : > { %v3240_v63 = vmax.f32 %v1402_v10, 0.0  ;;  %v1403_v29 = vsub.f32 %v3076_v18, %v1371_v43  ;;  %v1372_v2 = vmul.f32 2.0, %v1154_v15  ;;  %2509 = vrsqrt.f32 %v3232_v26 }
  0xf4   : > { %v2498_v17 = vpop.eup %2497  ;;  %v1158_v9 = vpop.f32.mrf.mxu1  ;;  %v1485_v15 = vand.u32 2147483648, %v3185_v52 }
  0xf5   : > { %2511 = vrsqrt.f32 %v3240_v63  ;;  %v3249_v11 = vmax.f32 %v1403_v29, 0.0  ;;  %v1404_v54 = vsub.f32 %v3080_v19, %v1372_v2  ;;  %v1373_v18 = vmul.f32 2.0, %v1158_v9 }
  0xf6   : > { %v2500_v43 = vpop.eup %2499  ;;  %v1160_v1 = vpop.f32.mrf.mxu1  ;;  %v1460_v10 = vmul.f32 %v2498_v17, %v3136_v59 }
  0xf7   : > { %v3258_v4 = vmax.f32 %v1404_v54, 0.0  ;;  %v1405_v29 = vsub.f32 %v3094_v30, %v1373_v18  ;;  %v1374_v19 = vmul.f32 2.0, %v1160_v1  ;;  %2513 = vrsqrt.f32 %v3249_v11 }
  0xf8   : > { %v2502_v9 = vpop.eup %2501  ;;  %v1164_v17 = vpop.f32.mrf.mxu1  ;;  %v1462_v16 = vsel %vm1461_vm11, %v3136_v59, %v1460_v10  ;;  %v1467_v54 = vmul.f32 %v2500_v43, %v3152_v7  ;;  %vm1496_vm11 = vcmp.eq.f32.partialorder %v3217_v14, inf }
  0xf9   : > { %2515 = vrsqrt.f32 %v3258_v4  ;;  %v3271_v30 = vmax.f32 %v1405_v29, 0.0  ;;  %v1406_v18 = vsub.f32 %v3098_v27, %v1374_v19  ;;  %v1375_v1 = vmul.f32 2.0, %v1164_v17 }
  0xfa   : > { %v2504_v2 = vpop.eup %2503  ;;  %v1166_v44 = vpop.f32.mrf.mxu1  ;;  %v3277_v23 = vsel %vm1463_vm12, %v1464_v62, %v1462_v16  ;;  %v1469_v43 = vsel %vm1468_vm13, %v3152_v7, %v1467_v54  ;;  %v1474_v10 = vmul.f32 %v2502_v9, %v3164_v37  ;;  %vm1498_vm12 = vcmp.eq.f32.partialorder %v3217_v14, 0.0 }
  0xfb   : > { %2517 = vrsqrt.f32 %v3271_v30  ;;  %v3285_v27 = vmax.f32 %v1406_v18, 0.0  ;;  %v1407_v19 = vsub.f32 %v3102_v31, %v1375_v1  ;;  %v1376_v17 = vmul.f32 2.0, %v1166_v44 }
  0xfc   : > { %v2506_v59 = vpop.eup %2505  ;;  %v1170_v16 = vpop.f32.mrf.mxu1  ;;  %v3291_v62 = vsel %vm1470_vm14, %v1471_v20, %v1469_v43  ;;  %v1852_v9 = vsel %vm1756_vm1, 1e+30, %v3277_v23  ;;  %v1476_v54 = vsel %vm1475_vm15, %v3164_v37, %v1474_v10  ;;  %v1481_v31 = vmul.f32 %v2504_v2, %v3185_v52 }
  0xfd   : > { %2519 = vrsqrt.f32 %v3285_v27  ;;  %v3303_v44 = vmax.f32 %v1407_v19, 0.0  ;;  %v1408_v7 = vsub.f32 %v3106_v38, %v1376_v17  ;;  %v1377_v20 = vmul.f32 2.0, %v1170_v16  ;;  %v3320_v10 = vpop.f32.mrf.mxu0 }
  0xfe   : > { %vm1503_vm13 = vcmp.eq.f32.partialorder %v3232_v26, inf  ;;  %vm1510_vm14 = vcmp.eq.f32.partialorder %v3240_v63, inf  ;;  %v1853_v18 = vsel %vm4420_vm2, 1e+30, %v3291_v62  ;;  %v1172_v1 = vpop.f32.mrf.mxu1  ;;  %v3314_v2 = vsel %vm1477_vm0, %v1478_v13, %v1476_v54  ;;  %v2508_v19 = vpop.eup %2507 }
  0xff   : > { %v1483_v43 = vsel %vm1482_vm10, %v3185_v52, %v1481_v31  ;;  %v1488_v38 = vmul.f32 %v2506_v59, %v3200_v8  ;;  %2521 = vrsqrt.f32 %v3303_v44  ;;  %v3323_v17 = vmax.f32 %v1408_v7, 0.0 }
 0x100   : > { %v1409_v16 = vsub.f32 %v3110_v40, %v1377_v20  ;;  %v1884_v29 = vmin.f32 %v1852_v9, %v1853_v18  ;;  %vm1505_vm15 = vcmp.eq.f32.partialorder %v3232_v26, 0.0  ;;  %vm1512_vm0 = vcmp.eq.f32.partialorder %v3240_v63, 0.0  ;;  %v1176_v13 = vpop.f32.mrf.mxu1  ;;  %v2510_v9 = vpop.eup %2509 }
 0x101   : > { %v1378_v37 = vmul.f32 2.0, %v1172_v1  ;;  %v3330_v54 = vsel %vm1484_vm9, %v1485_v15, %v1483_v43  ;;  %v1854_v59 = vsel %vm4410_vm3, 1e+30, %v3314_v2  ;;  %v1490_v40 = vsel %vm1489_vm8, %v3200_v8, %v1488_v38 }
 0x102   : > { %4462 = vst [vmem:[#allocation17_spill] sm:$0xff] %v3330_v54  ;;  %2523 = vrsqrt.f32 %v3323_v17  ;;  %v3340_v31 = vmax.f32 %v1409_v16, 0.0  ;;  %1885 = vmin.xlane.f32.xlu0 %v1884_v29  ;;  %v1379_v7 = vmul.f32 2.0, %v1176_v13  ;;  %v1855_v52 = vsel %vm4408_vm4, 1e+30, %v3330_v54  ;;  %v2512_v15 = vpop.eup %2511  ;;  %v1178_v1 = vpop.f32.mrf.mxu1 }
 0x103   : > { %vm1517_vm9 = vcmp.eq.f32.partialorder %v3249_v11, inf  ;;  %v1410_v20 = vsub.f32 %v3114_v41, %v1378_v37  ;;  %v1887_v18 = vmin.f32 %v1854_v59, %v1855_v52  ;;  %v4463_v43 = vand.u32 2147483648, %v3200_v8  ;;  %v3355_v16 = vpop.f32.mrf.mxu0 }
 0x104   : > { %v1495_v29 = vmul.f32 %v2508_v19, %v3217_v14  ;;  %2525 = vrsqrt.f32 %v3340_v31  ;;  %v1411_v13 = vsub.f32 %v3120_v47, %v1379_v7  ;;  %v1380_v3 = vmul.f32 2.0, %v1178_v1  ;;  %v1182_v8 = vpop.f32.mrf.mxu1  ;;  %v3371_v7 = vpop.permute.xlu0 %1716 }
 0x105   : > { %v3352_v38 = vsel %vm1491_vm7, %v4463_v43, %v1490_v40  ;;  %vm1519_vm8 = vcmp.eq.f32.partialorder %v3249_v11, 0.0  ;;  %v3364_v37 = vmax.f32 %v1410_v20, 0.0  ;;  %1888 = vmin.xlane.f32.xlu1 %v1887_v18  ;;  %v1502_v59 = vmul.f32 %v2510_v9, %v3232_v26  ;;  %v2514_v40 = vpop.eup %2513 }
 0x106   : > { %4464 = vst [vmem:[#allocation18_spill] sm:$0xff] %v3352_v38  ;;  %v1856_v41 = vsel %vm4403_vm5, 1e+30, %v3352_v38  ;;  %v1497_v19 = vsel %vm1496_vm11, %v3217_v14, %v1495_v29  ;;  %v1509_v47 = vmul.f32 %v2512_v15, %v3240_v63  ;;  %v3373_v52 = vmax.f32 %v1411_v13, 0.0  ;;  %v2516_v38 = vpop.eup %2515  ;;  %v1184_v15 = vpop.f32.mrf.mxu1 }
 0x107   : > { %v1412_v1 = vsub.f32 %v3128_v28, %v1380_v3  ;;  %v1381_v43 = vmul.f32 2.0, %v1182_v8  ;;  %v4465_v20 = vand.u32 2147483648, %v3217_v14  ;;  %2527 = vrsqrt.f32 %v3364_v37  ;;  %v3393_v14 = vpop.f32.mrf.mxu0 }
 0x108   : > { %v1504_v28 = vsel %vm1503_vm13, %v3232_v26, %v1502_v59  ;;  %v1511_v3 = vsel %vm1510_vm14, %v3240_v63, %v1509_v47  ;;  %2529 = vrsqrt.f32 %v3373_v52  ;;  %v1188_v45 = vpop.f32.mrf.mxu1  ;;  %v4469_v47 = vand.u32 2147483648, %v3240_v63 }
 0x109   : > { %v3380_v18 = vsel %vm1498_vm12, %v4465_v20, %v1497_v19  ;;  %v3396_v29 = vmax.f32 %v1412_v1, 0.0  ;;  %v1413_v13 = vsub.f32 %v3143_v35, %v1381_v43  ;;  %v2518_v19 = vpop.eup %2517  ;;  %v1382_v20 = vmul.f32 2.0, %v1184_v15  ;;  %v3428_v15 = vpop.f32.mrf.mxu0 }
 0x10a   : > { %4466 = vst [vmem:[#allocation19_spill] sm:$0xff] %v3380_v18  ;;  %v1857_v9 = vsel %vm4402_vm6, 1e+30, %v3380_v18  ;;  %v4467_v18 = vand.u32 2147483648, %v3232_v26  ;;  %v3409_v36 = vsel %vm1512_vm0, %v4469_v47, %v1511_v3  ;;  %v1516_v1 = vmul.f32 %v2514_v40, %v3249_v11  ;;  %v2520_v43 = vpop.eup %2519  ;;  %v1190_v40 = vpop.f32.mrf.mxu1 }
 0x10b   : > { %v1890_v8 = vmin.f32 %v1856_v41, %v1857_v9  ;;  %4470 = vst [vmem:[#allocation21_spill] sm:$0xff] %v3409_v36  ;;  %2531 = vrsqrt.f32 %v3396_v29  ;;  %v3413_v35 = vmax.f32 %v1413_v13, 0.0  ;;  %v1383_v41 = vmul.f32 2.0, %v1188_v45 }
 0x10c   : > { %v3403_v59 = vsel %vm1505_vm15, %v4467_v18, %v1504_v28  ;;  %vm4471_vm7 = vcmp.eq.s32.totalorder %v3035_v0, %v2953_v33  ;;  %v1414_v18 = vsub.f32 %v3147_v5, %v1382_v20  ;;  %vm4472_vm10 = vcmp.eq.s32.totalorder %v3035_v0, %v2955_v34  ;;  %v3430_v28 = vpop.permute.xlu0 %1719  ;;  %v1194_v47 = vpop.f32.mrf.mxu1 }
 0x10d   : > { %4468 = vst [vmem:[#allocation20_spill] sm:$0xff] %v3403_v59  ;;  %1891 = vmin.xlane.f32.xlu0 %v1890_v8  ;;  %v1858_v26 = vsel %vm4471_vm7, 1e+30, %v3403_v59  ;;  %v1859_v63 = vsel %vm4472_vm10, 1e+30, %v3409_v36  ;;  %v1518_v9 = vsel %vm1517_vm9, %v3249_v11, %v1516_v1  ;;  %v1523_v45 = vmul.f32 %v2516_v38, %v3258_v4  ;;  %v3434_v8 = vpop.eup %2521 }
 0x10e   : > { %2533 = vrsqrt.f32 %v3413_v35  ;;  %v1415_v5 = vsub.f32 %v3174_v32, %v1383_v41  ;;  %v1893_v3 = vmin.f32 %v1858_v26, %v1859_v63  ;;  %v1384_v13 = vmul.f32 2.0, %v1190_v40 }
 0x10f   : > { %vm1766_vm11 = vcmp.eq.s32.totalorder %v3371_v7, %v2953_v33  ;;  %v3438_v20 = vmax.f32 %v1414_v18, 0.0  ;;  %v4473_v38 = vand.u32 2147483648, %v3249_v11  ;;  %vm1524_vm12 = vcmp.eq.f32.partialorder %v3258_v4, inf  ;;  %v3452_v63 = vpop.eup %2523 }
 0x110   : > { %vm1526_vm13 = vcmp.eq.f32.partialorder %v3258_v4, 0.0  ;;  %v3448_v32 = vmax.f32 %v1415_v5, 0.0  ;;  %v1416_v41 = vsub.f32 %v3178_v49, %v1384_v13  ;;  %v1385_v26 = vmul.f32 2.0, %v1194_v47  ;;  %v3463_v5 = vpop.f32.mrf.mxu0 }
 0x111   : > { %v3444_v1 = vsel %vm1519_vm8, %v4473_v38, %v1518_v9  ;;  %1894 = vmin.xlane.f32.xlu0 %v1893_v3  ;;  %v1525_v18 = vsel %vm1524_vm12, %v3258_v4, %v1523_v45  ;;  %vm1767_vm14 = vcmp.eq.s32.totalorder %v3371_v7, %v2955_v34  ;;  %2535 = vrsqrt.f32 %v3438_v20  ;;  %v1196_v9 = vpop.f32.mrf.mxu1  ;;  %v3469_v47 = vpop.eup %2525 }
 0x112   : > { %4474 = vst [vmem:[#allocation22_spill] sm:$0xff] %v3444_v1  ;;  %v1527_v11 = vand.u32 2147483648, %v3258_v4  ;;  %vm4475_vm15 = vcmp.eq.s32.totalorder %v3116_v22, %v2953_v33  ;;  %v1530_v49 = vmul.f32 %v2518_v19, %v3271_v30  ;;  %2537 = vrsqrt.f32 %v3448_v32  ;;  %v3492_v59 = vpop.f32.mrf.mxu0 }
 0x113   : > { %v1860_v40 = vsel %vm4475_vm15, 1e+30, %v3444_v1  ;;  %v3466_v45 = vmax.f32 %v1416_v41, 0.0  ;;  %v1417_v3 = vsub.f32 %v3182_v50, %v1385_v26  ;;  %v1386_v13 = vmul.f32 2.0, %v1196_v9  ;;  %v1200_v0 = vpop.f32.mrf.mxu1  ;;  %v3478_v1 = vpop.permute.xlu0 %1722 }
 0x114   : > { %v3473_v38 = vsel %vm1526_vm13, %v1527_v11, %v1525_v18  ;;  %vm1531_vm0 = vcmp.eq.f32.partialorder %v3271_v30, inf  ;;  %vm1533_vm9 = vcmp.eq.f32.partialorder %v3271_v30, 0.0  ;;  %v1534_v19 = vand.u32 2147483648, %v3271_v30 }
 0x115   : > { %4476 = vst [vmem:[#allocation23_spill] sm:$0xff] %v3473_v38  ;;  %2539 = vrsqrt.f32 %v3466_v45  ;;  %v3481_v41 = vmax.f32 %v1417_v3, 0.0  ;;  %vm4477_vm8 = vcmp.eq.s32.totalorder %v3116_v22, %v2955_v34  ;;  %v1418_v50 = vsub.f32 %v3190_v61, %v1386_v13  ;;  %v1202_v36 = vpop.f32.mrf.mxu1  ;;  %v3494_v3 = vpop.eup %2527 }
 0x116   : > { %v1861_v4 = vsel %vm4477_vm8, 1e+30, %v3473_v38  ;;  %vm1768_vm7 = vcmp.eq.s32.totalorder %v3430_v28, %v2953_v33  ;;  %v1387_v18 = vmul.f32 2.0, %v1200_v0  ;;  %v1532_v11 = vsel %vm1531_vm0, %v3271_v30, %v1530_v49  ;;  %v3504_v0 = vpop.eup %2529 }
 0x117   : > { %v1896_v26 = vmin.f32 %v1860_v40, %v1861_v4  ;;  %v1537_v9 = vmul.f32 %v2520_v43, %v3285_v27  ;;  %2541 = vrsqrt.f32 %v3481_v41  ;;  %v3497_v22 = vmax.f32 %v1418_v50, 0.0  ;;  %v1206_v13 = vpop.f32.mrf.mxu1 }
 0x118   : > { %v3501_v61 = vsel %vm1533_vm9, %v1534_v19, %v1532_v11  ;;  %vm1538_vm10 = vcmp.eq.f32.partialorder %v3285_v27, inf  ;;  %vm1769_vm12 = vcmp.eq.s32.totalorder %v3430_v28, %v2955_v34  ;;  %v1419_v43 = vsub.f32 %v3194_v46, %v1387_v18  ;;  %v3517_v50 = vpop.eup %2531  ;;  %v3526_v11 = vpop.f32.mrf.mxu0 }
 0x119   : > { %4478 = vst [vmem:[#allocation24_spill] sm:$0xff] %v3501_v61  ;;  %1897 = vmin.xlane.f32.xlu1 %v1896_v26  ;;  %v1539_v40 = vsel %vm1538_vm10, %v3285_v27, %v1537_v9  ;;  %vm1540_vm13 = vcmp.eq.f32.partialorder %v3285_v27, 0.0  ;;  %v1541_v49 = vand.u32 2147483648, %v3285_v27  ;;  %2543 = vrsqrt.f32 %v3497_v22  ;;  %v1208_v27 = vpop.f32.mrf.mxu1  ;;  %v3528_v9 = vpop.permute.xlu0 %1725 }
 0x11a   : > { %v1862_v30 = vsel %vm1766_vm11, 1e+30, %v3501_v61  ;;  %v1388_v19 = vmul.f32 2.0, %v1202_v36  ;;  %v1389_v4 = vmul.f32 2.0, %v1206_v13  ;;  %v3519_v26 = vmax.f32 %v1419_v43, 0.0  ;;  %4480 = vst [vmem:[#allocation26_spill] sm:$0xff] %v3528_v9 }
 0x11b   : > { %v3521_v46 = vsel %vm1540_vm13, %v1541_v49, %v1539_v40  ;;  %v1544_v18 = vmul.f32 %v3434_v8, %v3303_v44  ;;  %vm1545_vm15 = vcmp.eq.f32.partialorder %v3303_v44, inf  ;;  %vm1547_vm0 = vcmp.eq.f32.partialorder %v3303_v44, 0.0  ;;  %v3537_v49 = vpop.eup %2533  ;;  %v1212_v38 = vpop.f32.mrf.mxu1 }
 0x11c   : > { %4479 = vst [vmem:[#allocation25_spill] sm:$0xff] %v3521_v46  ;;  %v1863_v36 = vsel %vm1767_vm14, 1e+30, %v3521_v46  ;;  %v1420_v43 = vsub.f32 %v3205_v58, %v1388_v19  ;;  %v1421_v40 = vsub.f32 %v3208_v21, %v1389_v4  ;;  %vm4411_vm9 = vcmp.eq.s32.totalorder %v3478_v1, %v2953_v33 }
 0x11d   : > { %2545 = vrsqrt.f32 %v3519_v26  ;;  %v1899_v8 = vmin.f32 %v1862_v30, %v1863_v36  ;;  %v1546_v13 = vsel %vm1545_vm15, %v3303_v44, %v1544_v18  ;;  %v1548_v61 = vand.u32 2147483648, %v3303_v44  ;;  %v1214_v4 = vpop.f32.mrf.mxu1  ;;  %v3557_v18 = vpop.f32.mrf.mxu0 }
 0x11e   : > { %v3544_v46 = vmax.f32 %v1420_v43, 0.0  ;;  %v3546_v58 = vmax.f32 %v1421_v40, 0.0  ;;  %v1551_v21 = vmul.f32 %v3452_v63, %v3323_v17  ;;  %vm1552_vm8 = vcmp.eq.f32.partialorder %v3323_v17, inf  ;;  %v3559_v36 = vpop.eup %2535 }
 0x11f   : > { %vm4407_vm10 = vcmp.eq.s32.totalorder %v3478_v1, %v2955_v34  ;;  %1900 = vmin.xlane.f32.xlu0 %v1899_v8  ;;  %v3553_v19 = vsel %vm1547_vm0, %v1548_v61, %v1546_v13  ;;  %vm1554_vm13 = vcmp.eq.f32.partialorder %v3323_v17, 0.0  ;;  %v1555_v44 = vand.u32 2147483648, %v3323_v17  ;;  %v3567_v40 = vpop.eup %2537  ;;  %v3592_v25 = vpop.f32.mrf.mxu0 }
 0x120   : > { %4481 = vst [vmem:[#allocation27_spill] sm:$0xff] %v3553_v19  ;;  %v1390_v30 = vmul.f32 2.0, %v1208_v27  ;;  %2547 = vrsqrt.f32 %v3544_v46  ;;  %v1553_v63 = vsel %vm1552_vm8, %v3323_v17, %v1551_v21  ;;  %v1864_v61 = vsel %vm1768_vm7, 1e+30, %v3553_v19  ;;  %v3577_v17 = vpop.permute.xlu0 %1728  ;;  %v1218_v19 = vpop.f32.mrf.mxu1 }
 0x121   : > { %v1391_v43 = vmul.f32 2.0, %v1212_v38  ;;  %2549 = vrsqrt.f32 %v3546_v58  ;;  %v3570_v27 = vsel %vm1554_vm13, %v1555_v44, %v1553_v63  ;;  %v1558_v13 = vmul.f32 %v3469_v47, %v3340_v31 }
 0x122   : > { %4482 = vst [vmem:[#allocation28_spill] sm:$0xff] %v3570_v27  ;;  %v1422_v8 = vsub.f32 %v3211_v42, %v1390_v30  ;;  %vm4409_vm15 = vcmp.eq.s32.totalorder %v3528_v9, %v2953_v33  ;;  %v1865_v38 = vsel %vm1769_vm12, 1e+30, %v3570_v27  ;;  %vm1559_vm0 = vcmp.eq.f32.partialorder %v3340_v31, inf  ;;  %v3586_v42 = vpop.eup %2539 }
 0x123   : > { %v1423_v21 = vsub.f32 %v3214_v39, %v1391_v43  ;;  %vm1561_vm8 = vcmp.eq.f32.partialorder %v3340_v31, 0.0  ;;  %v1902_v44 = vmin.f32 %v1864_v61, %v1865_v38  ;;  %v1560_v30 = vsel %vm1559_vm0, %v3340_v31, %v1558_v13 }
 0x124   : > { %v3588_v47 = vmax.f32 %v1422_v8, 0.0  ;;  %v1562_v63 = vand.u32 2147483648, %v3340_v31  ;;  %v1565_v39 = vmul.f32 %v3494_v3, %v3364_v37  ;;  %vm1566_vm13 = vcmp.eq.f32.partialorder %v3364_v37, inf  ;;  %v3600_v43 = vpop.eup %2541 }
 0x125   : > { %v3594_v54 = vmax.f32 %v1423_v21, 0.0  ;;  %vm1568_vm6 = vcmp.eq.f32.partialorder %v3364_v37, 0.0  ;;  %vm4417_vm5 = vcmp.eq.s32.totalorder %v3528_v9, %v2955_v34  ;;  %1903 = vmin.xlane.f32.xlu1 %v1902_v44  ;;  %v1569_v8 = vand.u32 2147483648, %v3364_v37 }
 0x126   : > { %2551 = vrsqrt.f32 %v3588_v47  ;;  %v3607_v61 = vsel %vm1561_vm8, %v1562_v63, %v1560_v30  ;;  %v1392_v13 = vmul.f32 2.0, %v1214_v4  ;;  %v1567_v3 = vsel %vm1566_vm13, %v3364_v37, %v1565_v39  ;;  %v3616_v44 = vpop.eup %2543  ;;  %v3626_v37 = vpop.f32.mrf.mxu0 }
 0x127   : > { %4483 = vst [vmem:[#allocation29_spill] sm:$0xff] %v3607_v61  ;;  %2553 = vrsqrt.f32 %v3594_v54  ;;  %v1866_v38 = vsel %vm4411_vm9, 1e+30, %v3607_v61  ;;  %v1393_v21 = vmul.f32 2.0, %v1218_v19  ;;  %vm4416_vm0 = vcmp.eq.s32.totalorder %v3577_v17, %v2953_v33  ;;  %v3628_v63 = vpop.permute.xlu0 %1731  ;;  %v1220_v61 = vpop.f32.mrf.mxu1 }
 0x128   : > { %v3620_v31 = vsel %vm1568_vm6, %v1569_v8, %v1567_v3  ;;  %v1424_v30 = vsub.f32 %v3221_v12, %v1392_v13  ;;  %v1572_v4 = vmul.f32 %v3504_v0, %v3373_v52  ;;  %vm1573_vm8 = vcmp.eq.f32.partialorder %v3373_v52, inf }
 0x129   : > { %4484 = vst [vmem:[#allocation30_spill] sm:$0xff] %v3620_v31  ;;  %v1867_v19 = vsel %vm4407_vm10, 1e+30, %v3620_v31  ;;  %v1425_v39 = vsub.f32 %v3224_v57, %v1393_v21  ;;  %vm1575_vm6 = vcmp.eq.f32.partialorder %v3373_v52, 0.0  ;;  %v1576_v12 = vand.u32 2147483648, %v3373_v52  ;;  %v3661_v21 = vpop.f32.mrf.mxu0 }
 0x12a   : > { %v1905_v8 = vmin.f32 %v1866_v38, %v1867_v19  ;;  %v3637_v13 = vmax.f32 %v1424_v30, 0.0  ;;  %v1574_v0 = vsel %vm1573_vm8, %v3373_v52, %v1572_v4  ;;  %v1579_v3 = vmul.f32 %v3517_v50, %v3396_v29  ;;  %v3642_v27 = vpop.eup %2545  ;;  %v3663_v30 = vpop.permute.xlu1 %1734 }
 0x12b   : > { %vm4419_vm13 = vcmp.eq.s32.totalorder %v3577_v17, %v2955_v34  ;;  %v3646_v31 = vmax.f32 %v1425_v39, 0.0  ;;  %v3648_v57 = vsel %vm1575_vm6, %v1576_v12, %v1574_v0  ;;  %vm1580_vm10 = vcmp.eq.f32.partialorder %v3396_v29, inf  ;;  %v3696_v9 = vpop.permute.xlu0 %1737 }
 0x12c   : > { %4485 = vst [vmem:[#allocation31_spill] sm:$0xff] %v3648_v57  ;;  %vm1582_vm4 = vcmp.eq.f32.partialorder %v3396_v29, 0.0  ;;  %vm4418_vm8 = vcmp.eq.s32.totalorder %v3628_v63, %v2953_v33  ;;  %1906 = vmin.xlane.f32.xlu0 %v1905_v8  ;;  %2555 = vrsqrt.f32 %v3637_v13  ;;  %v1581_v52 = vsel %vm1580_vm10, %v3396_v29, %v1579_v3 }
 0x12d   : > { %v1583_v50 = vand.u32 2147483648, %v3396_v29  ;;  %v1868_v38 = vsel %vm4409_vm15, 1e+30, %v3648_v57  ;;  %2557 = vrsqrt.f32 %v3646_v31  ;;  %v1394_v4 = vmul.f32 2.0, %v1220_v61  ;;  %v3669_v39 = vpop.eup %2547  ;;  %v3694_v57 = vpop.f32.mrf.mxu0 }
 0x12e   : > { %v1586_v19 = vmul.f32 %v3537_v49, %v3413_v35  ;;  %vm1587_vm6 = vcmp.eq.f32.partialorder %v3413_v35, inf  ;;  %vm1589_vm10 = vcmp.eq.f32.partialorder %v3413_v35, 0.0  ;;  %v1590_v12 = vand.u32 2147483648, %v3413_v35  ;;  %v3677_v0 = vpop.eup %2549 }
 0x12f   : > { %v3671_v29 = vsel %vm1582_vm4, %v1583_v50, %v1581_v52  ;;  %v1593_v8 = vmul.f32 %v3559_v36, %v3438_v20  ;;  %vm1777_vm15 = vcmp.eq.s32.totalorder %v3628_v63, %v2955_v34  ;;  %v1426_v61 = vsub.f32 %v3227_v48, %v1394_v4 }
 0x130   : > { %4486 = vst [vmem:[#allocation32_spill] sm:$0xff] %v3671_v29  ;;  %v1869_v49 = vsel %vm4417_vm5, 1e+30, %v3671_v29  ;;  %v1588_v3 = vsel %vm1587_vm6, %v3413_v35, %v1586_v19  ;;  %vm1594_vm4 = vcmp.eq.f32.partialorder %v3438_v20, inf  ;;  %vm4421_vm3 = vcmp.eq.s32.totalorder %v3663_v30, %v2953_v33 }
 0x131   : > { %v1908_v36 = vmin.f32 %v1868_v38, %v1869_v49  ;;  %v3690_v52 = vsel %vm1589_vm10, %v1590_v12, %v1588_v3  ;;  %v1595_v50 = vsel %vm1594_vm4, %v3438_v20, %v1593_v8  ;;  %vm1596_vm9 = vcmp.eq.f32.partialorder %v3438_v20, 0.0  ;;  %v3733_v3 = vpop.f32.mrf.mxu0 }
 0x132   : > { %v3698_v29 = vmax.f32 %v1426_v61, 0.0  ;;  %v1597_v48 = vand.u32 2147483648, %v3438_v20  ;;  %v1870_v35 = vsel %vm4416_vm0, 1e+30, %v3690_v52  ;;  %v1600_v38 = vmul.f32 %v3567_v40, %v3448_v32 }
 0x133   : > { %vm4424_vm6 = vcmp.eq.s32.totalorder %v3663_v30, %v2955_v34  ;;  %1909 = vmin.xlane.f32.xlu1 %v1908_v36  ;;  %vm1601_vm10 = vcmp.eq.f32.partialorder %v3448_v32, inf  ;;  %vm1603_vm4 = vcmp.eq.f32.partialorder %v3448_v32, 0.0  ;;  %v1604_v4 = vand.u32 2147483648, %v3448_v32  ;;  %v3714_v19 = vpop.eup %2551 }
 0x134   : > { %v1607_v20 = vmul.f32 %v3586_v42, %v3466_v45  ;;  %2559 = vrsqrt.f32 %v3698_v29  ;;  %v3717_v12 = vsel %vm1596_vm9, %v1597_v48, %v1595_v50  ;;  %v1602_v40 = vsel %vm1601_vm10, %v3448_v32, %v1600_v38  ;;  %v3721_v8 = vpop.eup %2553  ;;  %v3735_v32 = vpop.permute.xlu1 %1740 }
 0x135   : > { %vm1608_vm0 = vcmp.eq.f32.partialorder %v3466_v45, inf  ;;  %vm4425_vm5 = vcmp.eq.s32.totalorder %v3696_v9, %v2953_v33  ;;  %v1871_v42 = vsel %vm4419_vm13, 1e+30, %v3717_v12  ;;  %v3729_v49 = vsel %vm1603_vm4, %v1604_v4, %v1602_v40 }
 0x136   : > { %4487 = vst [vmem:[#allocation33_spill] sm:$0xff] %v3729_v49  ;;  %v1609_v61 = vsel %vm1608_vm0, %v3466_v45, %v1607_v20  ;;  %vm1610_vm9 = vcmp.eq.f32.partialorder %v3466_v45, 0.0  ;;  %v1911_v36 = vmin.f32 %v1870_v35, %v1871_v42  ;;  %v1611_v50 = vand.u32 2147483648, %v3466_v45 }
 0x137   : > { %v1872_v48 = vsel %vm4418_vm8, 1e+30, %v3729_v49  ;;  %v1614_v38 = vmul.f32 %v3600_v43, %v3481_v41  ;;  %vm4427_vm0 = vcmp.eq.s32.totalorder %v3696_v9, %v2955_v34  ;;  %vm1615_vm10 = vcmp.eq.f32.partialorder %v3481_v41, inf }
 0x138   : > { %vm1617_vm4 = vcmp.eq.f32.partialorder %v3481_v41, 0.0  ;;  %v1618_v4 = vand.u32 2147483648, %v3481_v41  ;;  %v1621_v45 = vmul.f32 %v3616_v44, %v3497_v22  ;;  %1912 = vmin.xlane.f32.xlu0 %v1911_v36  ;;  %v3751_v35 = vsel %vm1610_vm9, %v1611_v50, %v1609_v61  ;;  %v3766_v61 = vpop.f32.mrf.mxu0  ;;  %v3770_v36 = vpop.permute.xlu0 %1743 }
 0x139   : > { %4488 = vst [vmem:[#allocation34_spill] sm:$0xff] %v3751_v35  ;;  %v1616_v20 = vsel %vm1615_vm10, %v3481_v41, %v1614_v38  ;;  %vm1622_vm8 = vcmp.eq.f32.partialorder %v3497_v22, inf  ;;  %vm1624_vm13 = vcmp.eq.f32.partialorder %v3497_v22, 0.0  ;;  %vm1782_vm2 = vcmp.eq.s32.totalorder %v3735_v32, %v2953_v33  ;;  %v2556_v41 = vpop.eup %2555  ;;  %4490 = vst [vmem:[#allocation36_spill] sm:$0xff] %v3770_v36 }
 0x13a   : > { %v1873_v43 = vsel %vm1777_vm15, 1e+30, %v3751_v35  ;;  %v3762_v40 = vsel %vm1617_vm4, %v1618_v4, %v1616_v20  ;;  %v1623_v44 = vsel %vm1622_vm8, %v3497_v22, %v1621_v45  ;;  %v1625_v42 = vand.u32 2147483648, %v3497_v22  ;;  %v2558_v22 = vpop.eup %2557  ;;  %v3800_v35 = vpop.f32.mrf.mxu0 }
 0x13b   : > { %4489 = vst [vmem:[#allocation35_spill] sm:$0xff] %v3762_v40  ;;  %vm4429_vm9 = vcmp.eq.s32.totalorder %v3735_v32, %v2955_v34  ;;  %v1914_v50 = vmin.f32 %v1872_v48, %v1873_v43  ;;  %v1874_v38 = vsel %vm4421_vm3, 1e+30, %v3762_v40  ;;  %v1628_v4 = vmul.f32 %v3642_v27, %v3519_v26 }
 0x13c   : > { %vm1629_vm8 = vcmp.eq.f32.partialorder %v3519_v26, inf  ;;  %v3779_v45 = vsel %vm1624_vm13, %v1625_v42, %v1623_v44  ;;  %vm1631_vm10 = vcmp.eq.f32.partialorder %v3519_v26, 0.0  ;;  %v1632_v20 = vand.u32 2147483648, %v3519_v26  ;;  %v3794_v44 = vpop.permute.xlu1 %1746 }
 0x13d   : > { %4491 = vst [vmem:[#allocation37_spill] sm:$0xff] %v3779_v45  ;;  %v1635_v48 = vmul.f32 %v3669_v39, %v3544_v46  ;;  %1915 = vmin.xlane.f32.xlu1 %v1914_v50  ;;  %v1875_v43 = vsel %vm4424_vm6, 1e+30, %v3779_v45  ;;  %v1630_v27 = vsel %vm1629_vm8, %v3519_v26, %v1628_v4  ;;  %vm1636_vm4 = vcmp.eq.f32.partialorder %v3544_v46, inf  ;;  %4492 = vst [vmem:[#allocation38_spill] sm:$0xff] %v3794_v44 }
 0x13e   : > { %vm1638_vm13 = vcmp.eq.f32.partialorder %v3544_v46, 0.0  ;;  %vm1784_vm3 = vcmp.eq.s32.totalorder %v3770_v36, %v2953_v33  ;;  %v1917_v42 = vmin.f32 %v1874_v38, %v1875_v43  ;;  %v3796_v40 = vsel %vm1631_vm10, %v1632_v20, %v1630_v27 }
 0x13f   : > { %4493 = vst [vmem:[#allocation39_spill] sm:$0xff] %v3796_v40  ;;  %v1637_v39 = vsel %vm1636_vm4, %v3544_v46, %v1635_v48  ;;  %v1639_v50 = vand.u32 2147483648, %v3544_v46  ;;  %vm1785_vm8 = vcmp.eq.s32.totalorder %v3770_v36, %v2955_v34  ;;  %v1876_v26 = vsel %vm4425_vm5, 1e+30, %v3796_v40  ;;  %v3832_v40 = vpop.f32.mrf.mxu0 }
 0x140   : > { %v1642_v4 = vmul.f32 %v3677_v0, %v3546_v58  ;;  %vm1643_vm10 = vcmp.eq.f32.partialorder %v3546_v58, inf  ;;  %vm1645_vm6 = vcmp.eq.f32.partialorder %v3546_v58, 0.0  ;;  %1918 = vmin.xlane.f32.xlu0 %v1917_v42  ;;  %v1646_v46 = vand.u32 2147483648, %v3546_v58 }
 0x141   : > { %v3812_v38 = vsel %vm1638_vm13, %v1639_v50, %v1637_v39  ;;  %v1649_v20 = vmul.f32 %v3714_v19, %v3588_v47  ;;  %vm1650_vm4 = vcmp.eq.f32.partialorder %v3588_v47, inf  ;;  %vm1786_vm5 = vcmp.eq.s32.totalorder %v3794_v44, %v2953_v33  ;;  %v2560_v27 = vpop.eup %2559 }
 0x142   : > { %4494 = vst [vmem:[#allocation40_spill] sm:$0xff] %v3812_v38  ;;  %v1877_v0 = vsel %vm4427_vm0, 1e+30, %v3812_v38  ;;  %v1644_v48 = vsel %vm1643_vm10, %v3546_v58, %v1642_v4  ;;  %vm1652_vm13 = vcmp.eq.f32.partialorder %v3588_v47, 0.0  ;;  %v1653_v43 = vand.u32 2147483648, %v3588_v47 }
 0x143   : > { %v1920_v42 = vmin.f32 %v1876_v26, %v1877_v0  ;;  %v3827_v39 = vsel %vm1645_vm6, %v1646_v46, %v1644_v48  ;;  %v1651_v19 = vsel %vm1650_vm4, %v3588_v47, %v1649_v20  ;;  %v1656_v50 = vmul.f32 %v3721_v8, %v3594_v54 }
 0x144   : > { %4495 = vst [vmem:[#allocation41_spill] sm:$0xff] %v3827_v39  ;;  %vm1787_vm0 = vcmp.eq.s32.totalorder %v3794_v44, %v2955_v34  ;;  %v3836_v38 = vsel %vm1652_vm13, %v1653_v43, %v1651_v19  ;;  %v1878_v58 = vsel %vm1782_vm2, 1e+30, %v3827_v39  ;;  %vm1657_vm6 = vcmp.eq.f32.partialorder %v3594_v54, inf }
 0x145   : > { %4496 = vst [vmem:[#allocation42_spill] sm:$0xff] %v3836_v38  ;;  %vm1659_vm10 = vcmp.eq.f32.partialorder %v3594_v54, 0.0  ;;  %1921 = vmin.xlane.f32.xlu1 %v1920_v42  ;;  %v1879_v47 = vsel %vm4429_vm9, 1e+30, %v3836_v38  ;;  %v1658_v8 = vsel %vm1657_vm6, %v3594_v54, %v1656_v50  ;;  %v1660_v26 = vand.u32 2147483648, %v3594_v54  ;;  %v3859_v42 = vpop.f32.mrf.mxu0 }
 0x146   : > { %v1663_v4 = vmul.f32 %v2556_v41, %v3637_v13  ;;  %v1923_v46 = vmin.f32 %v1878_v58, %v1879_v47  ;;  %vm1664_vm4 = vcmp.eq.f32.partialorder %v3637_v13, inf  ;;  %vm1666_vm13 = vcmp.eq.f32.partialorder %v3637_v13, 0.0 }
 0x147   : > { %v1667_v20 = vand.u32 2147483648, %v3637_v13  ;;  %v3854_v0 = vsel %vm1659_vm10, %v1660_v26, %v1658_v8  ;;  %v1670_v43 = vmul.f32 %v2558_v22, %v3646_v31  ;;  %vm1671_vm9 = vcmp.eq.f32.partialorder %v3646_v31, inf }
 0x148   : > { %4497 = vst [vmem:[#allocation43_spill] sm:$0xff] %v3854_v0  ;;  %v1665_v48 = vsel %vm1664_vm4, %v3637_v13, %v1663_v4  ;;  %1924 = vmin.xlane.f32.xlu0 %v1923_v46  ;;  %v1880_v41 = vsel %vm1784_vm3, 1e+30, %v3854_v0  ;;  %vm1673_vm6 = vcmp.eq.f32.partialorder %v3646_v31, 0.0  ;;  %v1674_v19 = vand.u32 2147483648, %v3646_v31  ;;  %v3889_v46 = vpop.f32.mrf.mxu0 }
 0x149   : > { %v3861_v54 = vsel %vm1666_vm13, %v1667_v20, %v1665_v48  ;;  %v1672_v22 = vsel %vm1671_vm9, %v3646_v31, %v1670_v43  ;;  %v1677_v50 = vmul.f32 %v2560_v27, %v3698_v29  ;;  %vm1678_vm10 = vcmp.eq.f32.partialorder %v3698_v29, inf }
 0x14a   : > { %4498 = vst [vmem:[#allocation44_spill] sm:$0xff] %v3861_v54  ;;  %v1881_v13 = vsel %vm1785_vm8, 1e+30, %v3861_v54  ;;  %v3876_v47 = vsel %vm1673_vm6, %v1674_v19, %v1672_v22  ;;  %vm1680_vm4 = vcmp.eq.f32.partialorder %v3698_v29, 0.0  ;;  %v1681_v8 = vand.u32 2147483648, %v3698_v29 }
 0x14b   : > { %v1926_v58 = vmin.f32 %v1880_v41, %v1881_v13  ;;  %4499 = vst [vmem:[#allocation45_spill] sm:$0xff] %v3876_v47  ;;  %v1679_v26 = vsel %vm1678_vm10, %v3698_v29, %v1677_v50  ;;  %v1882_v4 = vsel %vm1786_vm5, 1e+30, %v3876_v47  ;;  %v730_v31 = vmul.f32 %v3320_v10, %v3320_v10 }
 0x14c   : > { %v914_v27 = vmul.f32 %v3320_v10, %v3006_v51  ;;  %v3891_v20 = vsel %vm1680_vm4, %v1681_v8, %v1679_v26  ;;  %v731_v48 = vmul.f32 %v3355_v16, %v3355_v16  ;;  %v915_v29 = vmul.f32 %v3355_v16, %v3011_v53 }
 0x14d   : > { %1927 = vmin.xlane.f32.xlu1 %v1926_v58  ;;  %4500 = vst [vmem:[#allocation46_spill] sm:$0xff] %v3891_v20  ;;  %v732_v43 = vmul.f32 %v3393_v14, %v3393_v14  ;;  %v1883_v41 = vsel %vm1787_vm0, 1e+30, %v3891_v20  ;;  %v762_v10 = vmul.f32 %v730_v31, %v3006_v51  ;;  %v916_v19 = vmul.f32 %v3393_v14, %v3016_v56  ;;  %v3915_v14 = vpop.f32.mrf.mxu0 }
 0x14e   : > { %v733_v13 = vmul.f32 %v3428_v15, %v3428_v15  ;;  %v1929_v22 = vmin.f32 %v1882_v4, %v1883_v41  ;;  %v763_v50 = vmul.f32 %v731_v48, %v3011_v53  ;;  %v834_v16 = vadd.f32 %v731_v48, %v730_v31 }
 0x14f   : > { %v946_v58 = vadd.f32 %v915_v29, %v914_v27  ;;  %v764_v8 = vmul.f32 %v732_v43, %v3016_v56  ;;  %v917_v44 = vmul.f32 %v3428_v15, %v3028_v60  ;;  %v734_v51 = vmul.f32 %v3463_v5, %v3463_v5 }
 0x150   : > { %v765_v26 = vmul.f32 %v733_v13, %v3028_v60  ;;  %1930 = vmin.xlane.f32.xlu0 %v1929_v22  ;;  %v874_v20 = vadd.f32 %v763_v50, %v762_v10  ;;  %v835_v4 = vadd.f32 %v834_v16, %v732_v43  ;;  %v918_v53 = vmul.f32 %v3463_v5, %v3045_v6  ;;  %v3929_v10 = vld [vmem:[%s2981_s17 + $0x18] sm:$0xff]  ;;  %v4501_v22 = vld [vmem:[#allocation13_spill] sm:$0xff]  ;;  %v3937_v50 = vpop.f32.mrf.mxu0 }
 0x151   : > { %v947_v41 = vadd.f32 %v946_v58, %v916_v19  ;;  %v766_v56 = vmul.f32 %v734_v51, %v3045_v6  ;;  %v735_v31 = vmul.f32 %v3492_v59, %v3492_v59  ;;  %v919_v60 = vmul.f32 %v3492_v59, %v3089_v24 }
 0x152   : > { %v736_v15 = vmul.f32 %v3526_v11, %v3526_v11  ;;  %v875_v27 = vadd.f32 %v874_v20, %v764_v8  ;;  %v836_v48 = vadd.f32 %v835_v4, %v733_v13  ;;  %v920_v43 = vmul.f32 %v3526_v11, %v3131_v55 }
 0x153   : > { %v948_v29 = vadd.f32 %v947_v41, %v917_v44  ;;  %v767_v5 = vmul.f32 %v735_v31, %v3089_v24  ;;  %v737_v19 = vmul.f32 %v3557_v18, %v3557_v18  ;;  %v921_v59 = vmul.f32 %v3557_v18, %v4501_v22  ;;  %v4502_v24 = vld [vmem:[#allocation15_spill] sm:$0xff] }
 0x154   : > { %v768_v6 = vmul.f32 %v736_v15, %v3131_v55  ;;  %v876_v20 = vadd.f32 %v875_v27, %v765_v26  ;;  %v837_v44 = vadd.f32 %v836_v48, %v734_v51  ;;  %v738_v11 = vmul.f32 %v3592_v25, %v3592_v25 }
 0x155   : > { %v949_v13 = vadd.f32 %v948_v29, %v918_v53  ;;  %v769_v16 = vmul.f32 %v737_v19, %v4501_v22  ;;  %v922_v55 = vmul.f32 %v3592_v25, %v4502_v24  ;;  %v441_v58 = vunpack.c.0.s8 %v3929_v10  ;;  %v2561_v53 = vld [vmem:[%s2981_s17 + $0x10] sm:$0xff]  ;;  %v3952_v22 = vpop.f32.mrf.mxu0 }
 0x156   : > { %v739_v8 = vmul.f32 %v3626_v37, %v3626_v37  ;;  %v877_v4 = vadd.f32 %v876_v20, %v766_v56  ;;  %v838_v18 = vadd.f32 %v837_v44, %v735_v31  ;;  %v770_v26 = vmul.f32 %v738_v11, %v4502_v24 }
 0x157   : > { %v950_v41 = vadd.f32 %v949_v13, %v919_v60  ;;  %v473_v51 = vcvt.s32.f32 %v441_v58  ;;  %v442_v27 = vunpack.c.1.s8 %v2561_v53  ;;  %v740_v48 = vmul.f32 %v3661_v21, %v3661_v21  ;;  %v4503_v60 = vld [vmem:[#allocation16_spill] sm:$0xff] }
 0x158   : > { %v443_v29 = vunpack.c.1.s8 %v3929_v10  ;;  %v878_v25 = vadd.f32 %v877_v4, %v767_v5  ;;  %v839_v47 = vadd.f32 %v838_v18, %v736_v15  ;;  %v741_v56 = vmul.f32 %v3694_v57, %v3694_v57  ;;  %v3959_v15 = vpop.f32.mrf.mxu0 }
 0x159   : > { %v951_v36 = vadd.f32 %v950_v41, %v920_v43  ;;  %v771_v31 = vmul.f32 %v739_v8, %v473_v51  ;;  %v802_v20 = vadd.f32 %v4503_v60, %v473_v51  ;;  %v923_v44 = vmul.f32 %v3626_v37, %v473_v51 }
 0x15a   : > { %v474_v13 = vcvt.s32.f32 %v442_v27  ;;  %v879_v24 = vadd.f32 %v878_v25, %v768_v6  ;;  %v840_v58 = vadd.f32 %v839_v47, %v737_v19  ;;  %v475_v0 = vcvt.s32.f32 %v443_v29 }
 0x15b   : > { %v952_v54 = vadd.f32 %v951_v36, %v921_v59  ;;  %v444_v5 = vunpack.c.2.s8 %v2561_v53  ;;  %v742_v47 = vmul.f32 %v3733_v3, %v3733_v3  ;;  %v446_v27 = vunpack.c.3.s8 %v2561_v53 }
 0x15c   : > { %v772_v38 = vmul.f32 %v740_v48, %v474_v13  ;;  %v803_v39 = vadd.f32 %v802_v20, %v474_v13  ;;  %v924_v45 = vmul.f32 %v3661_v21, %v474_v13  ;;  %v880_v43 = vadd.f32 %v879_v24, %v769_v16 }
 0x15d   : > { %v841_v4 = vadd.f32 %v840_v58, %v738_v11  ;;  %v953_v18 = vadd.f32 %v952_v54, %v922_v55  ;;  %v773_v41 = vmul.f32 %v741_v56, %v475_v0  ;;  %v925_v60 = vmul.f32 %v3694_v57, %v475_v0 }
 0x15e   : > { %v804_v49 = vadd.f32 %v803_v39, %v475_v0  ;;  %v476_v37 = vcvt.s32.f32 %v444_v5  ;;  %v881_v36 = vadd.f32 %v880_v43, %v770_v26  ;;  %v445_v21 = vunpack.c.2.s8 %v3929_v10  ;;  %v3968_v39 = vpop.f32.mrf.mxu0  ;;  %v3983_v43 = vld [vmem:[%s2981_s17 + $0x28] sm:$0xff] }
 0x15f   : > { %v842_v6 = vadd.f32 %v841_v4, %v739_v8  ;;  %v954_v19 = vadd.f32 %v953_v18, %v923_v44  ;;  %v743_v54 = vmul.f32 %v3766_v61, %v3766_v61  ;;  %v744_v8 = vmul.f32 %v3800_v35, %v3800_v35 }
 0x160   : > { %v774_v59 = vmul.f32 %v742_v47, %v476_v37  ;;  %v805_v51 = vadd.f32 %v804_v49, %v476_v37  ;;  %v926_v16 = vmul.f32 %v3733_v3, %v476_v37  ;;  %v882_v57 = vadd.f32 %v881_v36, %v771_v31  ;;  %v3976_v3 = vld [vmem:[%s2981_s17 + $0x20] sm:$0xff]  ;;  %v3979_v13 = vpop.f32.mrf.mxu0 }
 0x161   : > { %v843_v0 = vadd.f32 %v842_v6, %v740_v48  ;;  %v955_v11 = vadd.f32 %v954_v19, %v924_v45  ;;  %v477_v55 = vcvt.s32.f32 %v445_v21  ;;  %v447_v26 = vunpack.c.3.s8 %v3929_v10 }
 0x162   : > { %v745_v49 = vmul.f32 %v3832_v40, %v3832_v40  ;;  %v883_v29 = vadd.f32 %v882_v57, %v772_v38  ;;  %v478_v48 = vcvt.s32.f32 %v446_v27  ;;  %v448_v5 = vunpack.c.0.s8 %v3976_v3  ;;  %v3990_v21 = vpop.f32.mrf.mxu0 }
 0x163   : > { %v844_v25 = vadd.f32 %v843_v0, %v741_v56  ;;  %v956_v20 = vadd.f32 %v955_v11, %v925_v60  ;;  %v775_v44 = vmul.f32 %v743_v54, %v477_v55  ;;  %v806_v31 = vadd.f32 %v805_v51, %v477_v55 }
 0x164   : > { %v927_v45 = vmul.f32 %v3766_v61, %v477_v55  ;;  %v479_v53 = vcvt.s32.f32 %v447_v26  ;;  %v884_v24 = vadd.f32 %v883_v29, %v773_v41  ;;  %v776_v4 = vmul.f32 %v744_v8, %v478_v48 }
 0x165   : > { %v845_v58 = vadd.f32 %v844_v25, %v742_v47  ;;  %v957_v10 = vadd.f32 %v956_v20, %v926_v16  ;;  %v807_v18 = vadd.f32 %v806_v31, %v478_v48  ;;  %v928_v38 = vmul.f32 %v3800_v35, %v478_v48 }
 0x166   : > { %v777_v56 = vmul.f32 %v745_v49, %v479_v53  ;;  %v885_v60 = vadd.f32 %v884_v24, %v774_v59  ;;  %v929_v61 = vmul.f32 %v3832_v40, %v479_v53  ;;  %v480_v19 = vcvt.s32.f32 %v448_v5 }
 0x167   : > { %v846_v37 = vadd.f32 %v845_v58, %v743_v54  ;;  %v958_v36 = vadd.f32 %v957_v10, %v927_v45  ;;  %v808_v6 = vadd.f32 %v807_v18, %v479_v53  ;;  %v746_v41 = vmul.f32 %v3859_v42, %v3859_v42 }
 0x168   : > { %v449_v47 = vunpack.c.0.s8 %v3983_v43  ;;  %v886_v51 = vadd.f32 %v885_v60, %v775_v44  ;;  %v747_v35 = vmul.f32 %v3889_v46, %v3889_v46  ;;  %v930_v0 = vmul.f32 %v3859_v42, %v480_v19  ;;  %v3999_v44 = vpop.f32.mrf.mxu0 }
 0x169   : > { %v847_v16 = vadd.f32 %v846_v37, %v744_v8  ;;  %v959_v57 = vadd.f32 %v958_v36, %v928_v38  ;;  %v778_v59 = vmul.f32 %v746_v41, %v480_v19  ;;  %v809_v54 = vadd.f32 %v808_v6, %v480_v19 }
 0x16a   : > { %v481_v40 = vcvt.s32.f32 %v449_v47  ;;  %v887_v11 = vadd.f32 %v886_v51, %v776_v4  ;;  %v450_v26 = vunpack.c.1.s8 %v3976_v3  ;;  %v748_v8 = vmul.f32 %v3915_v14, %v3915_v14  ;;  %v4008_v37 = vpop.f32.mrf.mxu0 }
 0x16b   : > { %v848_v55 = vadd.f32 %v847_v16, %v745_v49  ;;  %v960_v27 = vadd.f32 %v959_v57, %v929_v61  ;;  %v451_v42 = vunpack.c.1.s8 %v3983_v43  ;;  %v749_v49 = vmul.f32 %v3937_v50, %v3937_v50 }
 0x16c   : > { %v779_v29 = vmul.f32 %v747_v35, %v481_v40  ;;  %v810_v25 = vadd.f32 %v809_v54, %v481_v40  ;;  %v931_v20 = vmul.f32 %v3889_v46, %v481_v40  ;;  %v888_v31 = vadd.f32 %v887_v11, %v777_v56 }
 0x16d   : > { %v849_v45 = vadd.f32 %v848_v55, %v746_v41  ;;  %v961_v48 = vadd.f32 %v960_v27, %v930_v0  ;;  %v482_v53 = vcvt.s32.f32 %v450_v26  ;;  %v452_v24 = vunpack.c.2.s8 %v3976_v3  ;;  %v4016_v55 = vpop.f32.mrf.mxu0 }
 0x16e   : > { %v750_v58 = vmul.f32 %v3952_v22, %v3952_v22  ;;  %v889_v46 = vadd.f32 %v888_v31, %v778_v59  ;;  %v483_v56 = vcvt.s32.f32 %v451_v42  ;;  %v453_v6 = vunpack.c.2.s8 %v3983_v43 }
 0x16f   : > { %v850_v10 = vadd.f32 %v849_v45, %v747_v35  ;;  %v962_v5 = vadd.f32 %v961_v48, %v931_v20  ;;  %v780_v4 = vmul.f32 %v748_v8, %v482_v53  ;;  %v811_v18 = vadd.f32 %v810_v25, %v482_v53  ;;  %v4022_v25 = vld [vmem:[%s2981_s17 + $0x30] sm:$0xff] }
 0x170   : > { %v932_v38 = vmul.f32 %v3915_v14, %v482_v53  ;;  %v484_v60 = vcvt.s32.f32 %v452_v24  ;;  %v890_v36 = vadd.f32 %v889_v46, %v779_v29  ;;  %v751_v19 = vmul.f32 %v3959_v15, %v3959_v15  ;;  %v719_v46 = vpop.f32.mrf.mxu0 }
 0x171   : > { %v851_v61 = vadd.f32 %v850_v10, %v748_v8  ;;  %v781_v47 = vmul.f32 %v749_v49, %v483_v56  ;;  %v812_v51 = vadd.f32 %v811_v18, %v483_v56  ;;  %v933_v16 = vmul.f32 %v3937_v50, %v483_v56 }
 0x172   : > { %v963_v41 = vadd.f32 %v962_v5, %v932_v38  ;;  %v891_v57 = vadd.f32 %v890_v36, %v780_v4  ;;  %v782_v14 = vmul.f32 %v750_v58, %v484_v60  ;;  %v934_v59 = vmul.f32 %v3952_v22, %v484_v60 }
 0x173   : > { %v852_v35 = vadd.f32 %v851_v61, %v749_v49  ;;  %v813_v0 = vadd.f32 %v812_v51, %v484_v60  ;;  %v485_v40 = vcvt.s32.f32 %v453_v6  ;;  %v454_v11 = vunpack.c.3.s8 %v3976_v3 }
 0x174   : > { %v964_v54 = vadd.f32 %v963_v41, %v933_v16  ;;  %v892_v27 = vadd.f32 %v891_v57, %v781_v47  ;;  %v752_v29 = vmul.f32 %v3968_v39, %v3968_v39  ;;  %v455_v50 = vunpack.c.3.s8 %v3983_v43  ;;  %v721_v57 = vpop.f32.mrf.mxu0 }
 0x175   : > { %v853_v26 = vadd.f32 %v852_v35, %v750_v58  ;;  %v783_v8 = vmul.f32 %v751_v19, %v485_v40  ;;  %v814_v22 = vadd.f32 %v813_v0, %v485_v40  ;;  %v935_v31 = vmul.f32 %v3959_v15, %v485_v40  ;;  %v4031_v58 = vld [vmem:[%s2981_s17 + $0x38] sm:$0xff] }
 0x176   : > { %v965_v20 = vadd.f32 %v964_v54, %v934_v59  ;;  %v893_v45 = vadd.f32 %v892_v27, %v782_v14  ;;  %v486_v3 = vcvt.s32.f32 %v454_v11  ;;  %v487_v53 = vcvt.s32.f32 %v455_v50 }
 0x177   : > { %v854_v48 = vadd.f32 %v853_v26, %v751_v19  ;;  %v753_v49 = vmul.f32 %v3979_v13, %v3979_v13  ;;  %v456_v24 = vunpack.c.0.s8 %v4022_v25  ;;  %v754_v43 = vmul.f32 %v3990_v21, %v3990_v21 }
 0x178   : > { %v966_v42 = vadd.f32 %v965_v20, %v935_v31  ;;  %v894_v10 = vadd.f32 %v893_v45, %v783_v8  ;;  %v784_v5 = vmul.f32 %v752_v29, %v486_v3  ;;  %v815_v4 = vadd.f32 %v814_v22, %v486_v3  ;;  %v725_v22 = vpop.f32.mrf.mxu0 }
 0x179   : > { %v855_v15 = vadd.f32 %v854_v48, %v752_v29  ;;  %v936_v18 = vmul.f32 %v3968_v39, %v486_v3  ;;  %v785_v38 = vmul.f32 %v753_v49, %v487_v53  ;;  %v937_v56 = vmul.f32 %v3979_v13, %v487_v53 }
 0x17a   : > { %v488_v60 = vcvt.s32.f32 %v456_v24  ;;  %v895_v36 = vadd.f32 %v894_v10, %v784_v5  ;;  %v816_v61 = vadd.f32 %v815_v4, %v487_v53  ;;  %v457_v19 = vunpack.c.0.s8 %v4031_v58 }
 0x17b   : > { %v856_v6 = vadd.f32 %v855_v15, %v753_v49  ;;  %v967_v41 = vadd.f32 %v966_v42, %v936_v18  ;;  %v755_v16 = vmul.f32 %v3999_v44, %v3999_v44  ;;  %v458_v13 = vunpack.c.1.s8 %v4022_v25 }
 0x17c   : > { %v786_v47 = vmul.f32 %v754_v43, %v488_v60  ;;  %v938_v51 = vmul.f32 %v3990_v21, %v488_v60  ;;  %v896_v35 = vadd.f32 %v895_v36, %v785_v38  ;;  %v817_v14 = vadd.f32 %v816_v61, %v488_v60 }
 0x17d   : > { %v857_v39 = vadd.f32 %v856_v6, %v754_v43  ;;  %v489_v59 = vcvt.s32.f32 %v457_v19  ;;  %v968_v54 = vadd.f32 %v967_v41, %v937_v56  ;;  %v756_v0 = vmul.f32 %v4008_v37, %v4008_v37  ;;  %v727_v56 = vpop.f32.mrf.mxu0 }
 0x17e   : > { %v459_v40 = vunpack.c.1.s8 %v4031_v58  ;;  %v897_v11 = vadd.f32 %v896_v35, %v786_v47  ;;  %v490_v20 = vcvt.s32.f32 %v458_v13  ;;  %v757_v48 = vmul.f32 %v4016_v55, %v4016_v55  ;;  %v4504_v13 = vld [vmem:[#allocation11_spill] sm:$0xff] }
 0x17f   : > { %v787_v27 = vmul.f32 %v755_v16, %v489_v59  ;;  %v818_v26 = vadd.f32 %v817_v14, %v489_v59  ;;  %v858_v21 = vadd.f32 %v857_v39, %v755_v16  ;;  %v969_v29 = vadd.f32 %v968_v54, %v938_v51 }
 0x180   : > { %v939_v50 = vmul.f32 %v3999_v44, %v489_v59  ;;  %v491_v8 = vcvt.s32.f32 %v459_v40  ;;  %v460_v3 = vunpack.c.2.s8 %v4022_v25  ;;  %v788_v42 = vmul.f32 %v756_v0, %v490_v20 }
 0x181   : > { %v898_v31 = vadd.f32 %v897_v11, %v787_v27  ;;  %v859_v45 = vadd.f32 %v858_v21, %v756_v0  ;;  %v819_v49 = vadd.f32 %v818_v26, %v490_v20  ;;  %v940_v24 = vmul.f32 %v4008_v37, %v490_v20  ;;  %v4505_v0 = vld [vmem:[#allocation12_spill] sm:$0xff] }
 0x182   : > { %v970_v53 = vadd.f32 %v969_v29, %v939_v50  ;;  %v789_v43 = vmul.f32 %v757_v48, %v491_v8  ;;  %v941_v5 = vmul.f32 %v4016_v55, %v491_v8  ;;  %v492_v44 = vcvt.s32.f32 %v460_v3 }
 0x183   : > { %v860_v10 = vadd.f32 %v859_v45, %v757_v48  ;;  %v899_v4 = vadd.f32 %v898_v31, %v788_v42  ;;  %v758_v18 = vmul.f32 %v719_v46, %v719_v46  ;;  %v461_v38 = vunpack.c.2.s8 %v4031_v58  ;;  %v4506_v48 = vld [vmem:[#allocation14_spill] sm:$0xff] }
 0x184   : > { %v971_v15 = vadd.f32 %v970_v53, %v940_v24  ;;  %v942_v60 = vmul.f32 %v719_v46, %v492_v44  ;;  %v759_v36 = vmul.f32 %v721_v57, %v721_v57  ;;  %v462_v61 = vunpack.c.3.s8 %v4022_v25 }
 0x185   : > { %v760_v6 = vmul.f32 %v725_v22, %v725_v22  ;;  %v900_v19 = vadd.f32 %v899_v4, %v789_v43  ;;  %v790_v47 = vmul.f32 %v758_v18, %v492_v44  ;;  %v861_v37 = vadd.f32 %v860_v10, %v758_v18 }
 0x186   : > { %v972_v41 = vadd.f32 %v971_v15, %v941_v5  ;;  %v493_v51 = vcvt.s32.f32 %v461_v38  ;;  %v494_v16 = vcvt.s32.f32 %v462_v61  ;;  %v463_v55 = vunpack.c.3.s8 %v4031_v58 }
 0x187   : > { %v761_v35 = vmul.f32 %v727_v56, %v727_v56  ;;  %v901_v14 = vadd.f32 %v900_v19, %v790_v47  ;;  %v862_v59 = vadd.f32 %v861_v37, %v759_v36  ;;  %v820_v54 = vadd.f32 %v819_v49, %v491_v8 }
 0x188   : > { %v973_v39 = vadd.f32 %v972_v41, %v942_v60  ;;  %v2165_v46 = vadd.f32 %v4505_v0, %v4504_v13  ;;  %v791_v40 = vmul.f32 %v759_v36, %v493_v51  ;;  %v943_v11 = vmul.f32 %v721_v57, %v493_v51  ;;  %v4512_v0 = vld [vmem:[#allocation7_spill] sm:$0xff] }
 0x189   : > { %v944_v25 = vmul.f32 %v725_v22, %v494_v16  ;;  %v792_v27 = vmul.f32 %v760_v6, %v494_v16  ;;  %v495_v26 = vcvt.s32.f32 %v463_v55  ;;  %v821_v21 = vadd.f32 %v820_v54, %v492_v44  ;;  %v4509_v55 = vld [vmem:[#allocation5_spill] sm:$0xff] }
 0x18a   : > { %v863_v29 = vadd.f32 %v862_v59, %v760_v6  ;;  %v974_v50 = vadd.f32 %v973_v39, %v943_v11  ;;  %v902_v20 = vadd.f32 %v901_v14, %v791_v40  ;;  %v2166_v3 = vadd.f32 %v4506_v48, %v2165_v46  ;;  %v4514_v11 = vld [vmem:[#allocation18_spill] sm:$0xff] }
 0x18b   : > { %v945_v31 = vmul.f32 %v727_v56, %v495_v26  ;;  %v822_v45 = vadd.f32 %v821_v21, %v493_v51  ;;  %v4507_v42 = vmov 0.0   ;;  %v793_v49 = vmul.f32 %v761_v35, %v495_v26  ;;  %v4063_v4 = vpop.xlane.xlu0 %1885  ;;  %v4508_v51 = vld [vmem:[#allocation17_spill] sm:$0xff] }
 0x18c   : > { %v864_v58 = vadd.f32 %v863_v29, %v761_v35  ;;  %v975_v53 = vadd.f32 %v974_v50, %v944_v25  ;;  %v2396_v8 = vsel %vm1766_vm11, 1.0, %v4507_v42  ;;  %v903_v22 = vadd.f32 %v902_v20, %v792_v27  ;;  %v4515_v27 = vld [vmem:[#allocation19_spill] sm:$0xff] }
 0x18d   : > { %v823_v57 = vadd.f32 %v822_v45, %v494_v16  ;;  %v2167_v10 = vadd.f32 %v2396_v8, %v2166_v3  ;;  %v2397_v5 = vsel %vm1767_vm14, 1.0, %v4507_v42  ;;  %v2418_v18 = vadd.f32 -1.0, %v4063_v4  ;;  %v4518_v3 = vld [vmem:[#allocation8_spill] sm:$0xff] }
 0x18e   : > { %865 = vadd.xlane.f32.xlu0 %v864_v58  ;;  %v976_v24 = vadd.f32 %v975_v53, %v945_v31  ;;  %v904_v44 = vadd.f32 %v903_v22, %v793_v49  ;;  %v2398_v38 = vsel %vm1768_vm7, 1.0, %v4507_v42  ;;  %v4072_v36 = vpop.xlane.xlu1 %1888  ;;  %v2399_v47 = vsel %vm1769_vm12, 1.0, %v4507_v42  ;;  %v4520_v49 = vld [vmem:[#allocation20_spill] sm:$0xff]  ;;  %v4521_v22 = vld [vmem:[#allocation21_spill] sm:$0xff] }
 0x18f   : > { %v824_v43 = vadd.f32 %v823_v57, %v495_v26  ;;  %v2168_v15 = vadd.f32 %v2397_v5, %v2167_v10  ;;  %v1948_v56 = vsub.f32 %v3277_v23, %v2418_v18  ;;  %v1949_v60 = vsub.f32 %v3291_v62, %v2418_v18  ;;  %v4523_v5 = vld [vmem:[#allocation26_spill] sm:$0xff] }
 0x190   : > { %v2419_v61 = vadd.f32 -1.0, %v4072_v36  ;;  %vm4510_vm9 = vcmp.eq.s32.totalorder %v4509_v55, %v2955_v34  ;;  %vm4511_vm13 = vcmp.eq.s32.totalorder %v3478_v1, %v2953_v33  ;;  %vm4516_vm6 = vcmp.eq.s32.totalorder %v4512_v0, %v2955_v34  ;;  %v4530_v55 = vld [vmem:[#allocation23_spill] sm:$0xff] }
 0x191   : > { %825 = vadd.xlane.f32.xlu1 %v824_v43  ;;  %v2169_v6 = vadd.f32 %v2398_v38, %v2168_v15  ;;  %v1980_v19 = vmax.f32 %v1948_v56, 0.0  ;;  %v1981_v41 = vmax.f32 %v1949_v60, 0.0  ;;  %vm4517_vm10 = vcmp.eq.s32.totalorder %v3478_v1, %v2955_v34  ;;  %v4525_v60 = vld [vmem:[#allocation9_spill] sm:$0xff] }
 0x192   : > { %977 = vadd.xlane.f32.xlu0 %v976_v24  ;;  %v1950_v37 = vsub.f32 %v3314_v2, %v2419_v61  ;;  %v1951_v16 = vsub.f32 %v4508_v51, %v2419_v61  ;;  %v2400_v2 = vsel %vm4511_vm13, 1.0, %v4507_v42  ;;  %v2401_v58 = vsel %vm4517_vm10, 1.0, %v4507_v42  ;;  %v4529_v51 = vld [vmem:[#allocation22_spill] sm:$0xff] }
 0x193   : > { %v2012_v23 = vsel %vm1756_vm1, %v1980_v19, 0.0  ;;  %v2013_v62 = vsel %vm4510_vm9, %v1981_v41, 0.0  ;;  %v2170_v59 = vadd.f32 %v2399_v47, %v2169_v6  ;;  %vm4513_vm1 = vcmp.eq.s32.totalorder %v4512_v0, %v2953_v33 }
 0x194   : > { %v1982_v35 = vmax.f32 %v1950_v37, 0.0  ;;  %v1983_v14 = vmax.f32 %v1951_v16, 0.0  ;;  %v2044_v54 = vadd.f32 %v2013_v62, %v2012_v23  ;;  %vm4519_vm4 = vcmp.eq.s32.totalorder %v4518_v3, %v2953_v33 }
 0x195   : > { %905 = vadd.xlane.f32.xlu1 %v904_v44  ;;  %v2171_v50 = vadd.f32 %v2400_v2, %v2170_v59  ;;  %vm4522_vm9 = vcmp.eq.s32.totalorder %v4518_v3, %v2955_v34  ;;  %vm4524_vm13 = vcmp.eq.s32.totalorder %v4523_v5, %v2953_v33  ;;  %vm4528_vm10 = vcmp.eq.s32.totalorder %v4525_v60, %v2955_v34  ;;  %v4532_v2 = vld [vmem:[#allocation10_spill] sm:$0xff] }
 0x196   : > { %v4087_v39 = vpop.xlane.xlu0 %1891  ;;  %v2014_v46 = vsel %vm4513_vm1, %v1982_v35, 0.0  ;;  %v2015_v21 = vsel %vm4516_vm6, %v1983_v14, 0.0  ;;  %v2402_v44 = vsel %vm4524_vm13, 1.0, %v4507_v42  ;;  %vm4526_vm1 = vcmp.eq.s32.totalorder %v4525_v60, %v2953_v33 }
 0x197   : > { %v2420_v13 = vadd.f32 -1.0, %v4087_v39  ;;  %v2045_v40 = vadd.f32 %v2044_v54, %v2014_v46  ;;  %v2172_v43 = vadd.f32 %v2401_v58, %v2171_v50  ;;  %vm4527_vm6 = vcmp.eq.s32.totalorder %v4523_v5, %v2955_v34 }
 0x198   : > { %v2403_v47 = vsel %vm4527_vm6, 1.0, %v4507_v42  ;;  %vm4534_vm13 = vcmp.eq.s32.totalorder %v4532_v2, %v2955_v34  ;;  %v2084_v3 = vsub.f32 1.0, %v4063_v4  ;;  %vm4538_vm6 = vcmp.eq.s32.totalorder %v3628_v63, %v2953_v33 }
 0x199   : > { %v1952_v25 = vsub.f32 %v4514_v11, %v2420_v13  ;;  %v1953_v26 = vsub.f32 %v4515_v27, %v2420_v13  ;;  %v2046_v20 = vadd.f32 %v2045_v40, %v2015_v21  ;;  %v2173_v19 = vadd.f32 %v2402_v44, %v2172_v43 }
 0x19a   : > { %v4102_v29 = vpop.xlane.xlu0 %1894 }
 0x19b   : > { %v1984_v31 = vmax.f32 %v1952_v25, 0.0  ;;  %v1985_v45 = vmax.f32 %v1953_v26, 0.0  ;;  %v2421_v48 = vadd.f32 -1.0, %v4102_v29  ;;  %v2174_v59 = vadd.f32 %v2403_v47, %v2173_v19  ;;  %v4535_v25 = vld [vmem:[#allocation24_spill] sm:$0xff]  ;;  %v4536_v26 = vld [vmem:[#allocation25_spill] sm:$0xff] }
 0x19d   : > { %v2016_v53 = vsel %vm4519_vm4, %v1984_v31, 0.0  ;;  %v1954_v57 = vsub.f32 %v4520_v49, %v2421_v48  ;;  %v1955_v24 = vsub.f32 %v4521_v22, %v2421_v48  ;;  %v2017_v10 = vsel %vm4522_vm9, %v1985_v45, 0.0 }
 0x19e   : > { %v2047_v8 = vadd.f32 %v2046_v20, %v2016_v53  ;;  %vm4531_vm4 = vcmp.eq.s32.totalorder %v3577_v17, %v2953_v33  ;;  %vm4533_vm9 = vcmp.eq.s32.totalorder %v4532_v2, %v2953_v33  ;;  %v2085_v20 = vsub.f32 1.0, %v4072_v36 }
 0x19f   : > { %v1986_v18 = vmax.f32 %v1954_v57, 0.0  ;;  %v1987_v38 = vmax.f32 %v1955_v24, 0.0  ;;  %v2404_v13 = vsel %vm4531_vm4, 1.0, %v4507_v42  ;;  %v2406_v36 = vsel %vm4538_vm6, 1.0, %v4507_v42 }
 0x1a0   : > { %v2048_v15 = vadd.f32 %v2047_v8, %v2017_v10  ;;  %v2175_v50 = vadd.f32 %v2404_v13, %v2174_v59  ;;  %v2086_v8 = vsub.f32 1.0, %v4087_v39  ;;  %v2101_v24 = vmax.f32 %v2085_v20, 0.0  ;;  %v4539_v39 = vld [vmem:[#allocation27_spill] sm:$0xff]  ;;  %v4542_v13 = vld [vmem:[#allocation29_spill] sm:$0xff] }
 0x1a1   : > { %v2018_v61 = vsel %vm4526_vm1, %v1986_v18, 0.0  ;;  %v2019_v37 = vsel %vm4528_vm10, %v1987_v38, 0.0  ;;  %vm4537_vm1 = vcmp.eq.s32.totalorder %v3577_v17, %v2955_v34  ;;  %v2087_v10 = vsub.f32 1.0, %v4102_v29 }
 0x1a2   : > { %v4121_v56 = vpop.xlane.xlu1 %1897  ;;  %v2049_v41 = vadd.f32 %v2048_v15, %v2018_v61  ;;  %v2405_v45 = vsel %vm4537_vm1, 1.0, %v4507_v42  ;;  %v4540_v15 = vld [vmem:[#allocation28_spill] sm:$0xff]  ;;  %v2100_v38 = vmax.f32 %v2084_v3, 0.0  ;;  %v2102_v61 = vmax.f32 %v2086_v8, 0.0 }
 0x1a3   : > { %v2422_v6 = vadd.f32 -1.0, %v4121_v56  ;;  %v2176_v22 = vadd.f32 %v2405_v45, %v2175_v50  ;;  %v2088_v47 = vsub.f32 1.0, %v4121_v56  ;;  %vm4548_vm10 = vcmp.eq.s32.totalorder %v3663_v30, %v2955_v34 }
 0x1a4   : > { %v2050_v62 = vadd.f32 %v2049_v41, %v2019_v37  ;;  %v2407_v41 = vsel %vm1777_vm15, 1.0, %v4507_v42  ;;  %vm4549_vm4 = vcmp.eq.s32.totalorder %v4523_v5, %v2953_v33  ;;  %vm4552_vm1 = vcmp.eq.s32.totalorder %v3696_v9, %v2955_v34 }
 0x1a5   : > { %v1956_v16 = vsub.f32 %v4529_v51, %v2422_v6  ;;  %v1957_v23 = vsub.f32 %v4530_v55, %v2422_v6  ;;  %v2177_v29 = vadd.f32 %v2406_v36, %v2176_v22  ;;  %v2103_v51 = vmax.f32 %v2087_v10, 0.0  ;;  %v4546_v36 = vld [vmem:[#allocation31_spill] sm:$0xff] }
 0x1a6   : > { %vm4553_vm6 = vcmp.eq.s32.totalorder %v3577_v17, %v2953_v33 }
 0x1a7   : > { %v1988_v35 = vmax.f32 %v1956_v16, 0.0  ;;  %v1989_v14 = vmax.f32 %v1957_v23, 0.0 }
 0x1a8   : > { %v1901_v54 = vpop.xlane.xlu0 %1900 }
 0x1a9   : > { %v2020_v0 = vsel %vm4533_vm9, %v1988_v35, 0.0  ;;  %v2423_v46 = vadd.f32 -1.0, %v1901_v54  ;;  %v2021_v11 = vsel %vm4534_vm13, %v1989_v14, 0.0  ;;  %v2089_v35 = vsub.f32 1.0, %v1901_v54 }
 0x1aa   : > { %v2051_v40 = vadd.f32 %v2050_v62, %v2020_v0  ;;  %v4543_v0 = vld [vmem:[#allocation30_spill] sm:$0xff]  ;;  %vm4550_vm9 = vcmp.eq.s32.totalorder %v3696_v9, %v2953_v33  ;;  %vm4551_vm13 = vcmp.eq.s32.totalorder %v4523_v5, %v2955_v34 }
 0x1ab   : > { %v1958_v27 = vsub.f32 %v4535_v25, %v2423_v46  ;;  %v1959_v21 = vsub.f32 %v4536_v26, %v2423_v46  ;;  %v2104_v25 = vmax.f32 %v2088_v47, 0.0 }
 0x1ac   : > { %v2052_v31 = vadd.f32 %v2051_v40, %v2021_v11  ;;  %v2178_v40 = vadd.f32 %v2407_v41, %v2177_v29 }
 0x1ad   : > { %v1990_v58 = vmax.f32 %v1958_v27, 0.0  ;;  %v1991_v48 = vmax.f32 %v1959_v21, 0.0 }
 0x1ae   : > { %v1904_v53 = vpop.xlane.xlu1 %1903 }
 0x1af   : > { %v2022_v49 = vsel %vm1766_vm11, %v1990_v58, 0.0  ;;  %v2424_v57 = vadd.f32 -1.0, %v1904_v53  ;;  %v2023_v4 = vsel %vm1767_vm14, %v1991_v48, 0.0  ;;  %vm2116_vm11 = vcmask 7168  }
 0x1b0   : > { %v2053_v43 = vadd.f32 %v2052_v31, %v2022_v49  ;;  %v2118_v37 = vsel %vm2116_vm11, %v2101_v24, 0.0  ;;  %vm4541_vm14 = vcmp.eq.s32.totalorder %v3663_v30, %v2953_v33  ;;  %v2117_v62 = vsel %vm2116_vm11, %v2100_v38, 0.0 }
 0x1b1   : > { %v1960_v44 = vsub.f32 %v4539_v39, %v2424_v57  ;;  %v1961_v18 = vsub.f32 %v4540_v15, %v2424_v57  ;;  %v2408_v23 = vsel %vm4541_vm14, 1.0, %v4507_v42  ;;  %v2120_v56 = vsel %vm2116_vm11, %v2102_v61, 0.0 }
 0x1b2   : > { %v2054_v60 = vadd.f32 %v2053_v43, %v2023_v4  ;;  %v2119_v11 = vadd.f32 %v2118_v37, %v2117_v62  ;;  %v2122_v26 = vsel %vm2116_vm11, %v2103_v51, 0.0  ;;  %v2090_v21 = vsub.f32 1.0, %v1904_v53  ;;  %v4547_v43 = vld [vmem:[#allocation32_spill] sm:$0xff] }
 0x1b3   : > { %v1992_v6 = vmax.f32 %v1960_v44, 0.0  ;;  %v1993_v19 = vmax.f32 %v1961_v18, 0.0  ;;  %v2105_v31 = vmax.f32 %v2089_v35, 0.0  ;;  %v2179_v3 = vadd.f32 %v2408_v23, %v2178_v40 }
 0x1b4   : > { %v2121_v20 = vadd.f32 %v2120_v56, %v2119_v11  ;;  %v2124_v49 = vsel %vm2116_vm11, %v2104_v25, 0.0  ;;  %v2106_v22 = vmax.f32 %v2090_v21, 0.0  ;;  %v2409_v4 = vsel %vm4548_vm10, 1.0, %v4507_v42 }
 0x1b5   : > { %v1907_v7 = vpop.xlane.xlu0 %1906  ;;  %v2024_v16 = vsel %vm1768_vm7, %v1992_v6, 0.0  ;;  %v2025_v59 = vsel %vm1769_vm12, %v1993_v19, 0.0  ;;  %vm4544_vm7 = vcmp.eq.s32.totalorder %v3478_v1, %v2953_v33  ;;  %vm4545_vm12 = vcmp.eq.s32.totalorder %v3478_v1, %v2955_v34 }
 0x1b6   : > { %v2425_v55 = vadd.f32 -1.0, %v1907_v7  ;;  %v2055_v14 = vadd.f32 %v2054_v60, %v2024_v16  ;;  %v2091_v58 = vsub.f32 1.0, %v1907_v7  ;;  %v2123_v8 = vadd.f32 %v2122_v26, %v2121_v20 }
 0x1b7   : > { %v2126_v39 = vsel %vm2116_vm11, %v2105_v31, 0.0  ;;  %v2180_v41 = vadd.f32 %v2409_v4, %v2179_v3  ;;  %v2128_v47 = vsel %vm2116_vm11, %v2106_v22, 0.0  ;;  %v2410_v23 = vsel %vm4550_vm9, 1.0, %v4507_v42  ;;  %v4555_v31 = vld [vmem:[#allocation34_spill] sm:$0xff] }
 0x1b8   : > { %v1962_v2 = vsub.f32 %v4542_v13, %v2425_v55  ;;  %v1963_v46 = vsub.f32 %v4543_v0, %v2425_v55  ;;  %v2056_v27 = vadd.f32 %v2055_v14, %v2025_v59  ;;  %v2125_v18 = vadd.f32 %v2124_v49, %v2123_v8 }
 0x1b9   : > { %v2107_v38 = vmax.f32 %v2091_v58, 0.0  ;;  %v2181_v5 = vadd.f32 %v2410_v23, %v2180_v41  ;;  %vm4556_vm14 = vcmp.eq.s32.totalorder %v3577_v17, %v2955_v34 }
 0x1ba   : > { %v1994_v50 = vmax.f32 %v1962_v2, 0.0  ;;  %v1995_v54 = vmax.f32 %v1963_v46, 0.0  ;;  %v2127_v29 = vadd.f32 %v2126_v39, %v2125_v18 }
 0x1bb   : > { %v2130_v62 = vsel %vm2116_vm11, %v2107_v38, 0.0 }
 0x1bc   : > { %v1910_v45 = vpop.xlane.xlu1 %1909  ;;  %v2026_v28 = vsel %vm4544_vm7, %v1994_v50, 0.0  ;;  %v2027_v53 = vsel %vm4545_vm12, %v1995_v54, 0.0  ;;  %v2129_v59 = vadd.f32 %v2128_v47, %v2127_v29  ;;  %v4554_v54 = vld [vmem:[#allocation33_spill] sm:$0xff]  ;;  %vm4559_vm7 = vcmp.eq.s32.totalorder %v3628_v63, %v2953_v33  ;;  %v4561_v29 = vld [vmem:[#allocation40_spill] sm:$0xff] }
 0x1bd   : > { %v2426_v48 = vadd.f32 -1.0, %v1910_v45  ;;  %v2057_v57 = vadd.f32 %v2056_v27, %v2026_v28  ;;  %v2092_v15 = vsub.f32 1.0, %v1910_v45  ;;  %vm4562_vm12 = vcmp.eq.s32.totalorder %v3663_v30, %v2953_v33 }
 0x1be   : > { %v2131_v11 = vadd.f32 %v2130_v62, %v2129_v59 }
 0x1bf   : > { %v1964_v24 = vsub.f32 %v4546_v36, %v2426_v48  ;;  %v1965_v10 = vsub.f32 %v4547_v43, %v2426_v48  ;;  %v2058_v44 = vadd.f32 %v2057_v57, %v2027_v53  ;;  %v2108_v51 = vmax.f32 %v2092_v15, 0.0  ;;  %v4557_v36 = vld [vmem:[#allocation35_spill] sm:$0xff]  ;;  %v4558_v43 = vld [vmem:[#allocation37_spill] sm:$0xff] }
 0x1c1   : > { %v1996_v60 = vmax.f32 %v1964_v24, 0.0  ;;  %v1997_v61 = vmax.f32 %v1965_v10, 0.0  ;;  %v1913_v6 = vpop.xlane.xlu0 %1912  ;;  %v2132_v25 = vsel %vm2116_vm11, %v2108_v51, 0.0 }
 0x1c2   : > { %v2427_v1 = vadd.f32 -1.0, %v1913_v6  ;;  %v2093_v19 = vsub.f32 1.0, %v1913_v6  ;;  %v2133_v8 = vadd.f32 %v2132_v25, %v2131_v11 }
 0x1c3   : > { %v2028_v7 = vsel %vm4549_vm4, %v1996_v60, 0.0  ;;  %v2029_v35 = vsel %vm4551_vm13, %v1997_v61, 0.0  ;;  %vm4567_vm4 = vcmp.eq.s32.totalorder %v3735_v32, %v2955_v34  ;;  %v2415_v32 = vsel %vm1785_vm8, 1.0, %v4507_v42 }
 0x1c4   : > { %v2059_v37 = vadd.f32 %v2058_v44, %v2028_v7  ;;  %v1966_v16 = vsub.f32 %v3690_v52, %v2427_v1  ;;  %v1967_v55 = vsub.f32 %v3717_v12, %v2427_v1  ;;  %v2109_v14 = vmax.f32 %v2093_v19, 0.0  ;;  %v4560_v19 = vld [vmem:[#allocation39_spill] sm:$0xff] }
 0x1c5   : > { %v2411_v52 = vsel %vm4552_vm1, 1.0, %v4507_v42  ;;  %v2412_v12 = vsel %vm1782_vm2, 1.0, %v4507_v42 }
 0x1c6   : > { %v1916_v56 = vpop.xlane.xlu1 %1915  ;;  %v2060_v13 = vadd.f32 %v2059_v37, %v2029_v35  ;;  %v1998_v2 = vmax.f32 %v1966_v16, 0.0  ;;  %v1999_v0 = vmax.f32 %v1967_v55, 0.0  ;;  %v2134_v50 = vsel %vm2116_vm11, %v2109_v14, 0.0 }
 0x1c7   : > { %v2428_v46 = vadd.f32 -1.0, %v1916_v56  ;;  %v2094_v40 = vsub.f32 1.0, %v1916_v56  ;;  %v2182_v53 = vadd.f32 %v2411_v52, %v2181_v5  ;;  %v2135_v44 = vadd.f32 %v2134_v50, %v2133_v8  ;;  %v4570_v8 = vld [vmem:[#allocation44_spill] sm:$0xff] }
 0x1c8   : > { %v2030_v27 = vsel %vm4553_vm6, %v1998_v2, 0.0  ;;  %v2031_v28 = vsel %vm4556_vm14, %v1999_v0, 0.0  ;;  %v4564_v0 = vld [vmem:[#allocation42_spill] sm:$0xff] }
 0x1c9   : > { %v1919_v26 = vpop.xlane.xlu0 %1918  ;;  %v2061_v21 = vadd.f32 %v2060_v13, %v2030_v27  ;;  %v1968_v20 = vsub.f32 %v4554_v54, %v2428_v46  ;;  %v1969_v45 = vsub.f32 %v4555_v31, %v2428_v46  ;;  %v2110_v58 = vmax.f32 %v2094_v40, 0.0  ;;  %v4563_v13 = vld [vmem:[#allocation41_spill] sm:$0xff] }
 0x1ca   : > { %v2429_v48 = vadd.f32 -1.0, %v1919_v26  ;;  %v2095_v3 = vsub.f32 1.0, %v1919_v26  ;;  %v2183_v27 = vadd.f32 %v2412_v12, %v2182_v53  ;;  %v2413_v54 = vsel %vm4567_vm4, 1.0, %v4507_v42 }
 0x1cb   : > { %v2062_v49 = vadd.f32 %v2061_v21, %v2031_v28  ;;  %v2000_v57 = vmax.f32 %v1968_v20, 0.0  ;;  %v2001_v22 = vmax.f32 %v1969_v45, 0.0  ;;  %v2136_v61 = vsel %vm2116_vm11, %v2110_v58, 0.0 }
 0x1cc   : > { %v1970_v24 = vsub.f32 %v4557_v36, %v2429_v48  ;;  %v1971_v10 = vsub.f32 %v4558_v43, %v2429_v48  ;;  %v2111_v4 = vmax.f32 %v2095_v3, 0.0  ;;  %v2137_v23 = vadd.f32 %v2136_v61, %v2135_v44  ;;  %v4569_v48 = vld [vmem:[#allocation43_spill] sm:$0xff] }
 0x1cd   : > { %v2032_v17 = vsel %vm4559_vm7, %v2000_v57, 0.0  ;;  %v2033_v38 = vsel %vm1777_vm15, %v2001_v22, 0.0  ;;  %vm4565_vm15 = vmmov %vm4548_vm10  ;;  %v2184_v53 = vadd.f32 %v2413_v54, %v2183_v27 }
 0x1ce   : > { %v1922_v39 = vpop.xlane.xlu1 %1921  ;;  %v2063_v60 = vadd.f32 %v2062_v49, %v2032_v17  ;;  %v2002_v6 = vmax.f32 %v1970_v24, 0.0  ;;  %v2003_v1 = vmax.f32 %v1971_v10, 0.0  ;;  %v2138_v55 = vsel %vm2116_vm11, %v2111_v4, 0.0  ;;  %vm4566_vm10 = vmmov %vm4550_vm9 }
 0x1cf   : > { %v2430_v15 = vadd.f32 -1.0, %v1922_v39  ;;  %v2096_v18 = vsub.f32 1.0, %v1922_v39  ;;  %v2139_v40 = vadd.f32 %v2138_v55, %v2137_v23  ;;  %vm4568_vm9 = vmmov %vm4552_vm1  ;;  %v2414_v10 = vsel %vm1784_vm3, 1.0, %v4507_v42 }
 0x1d0   : > { %v2064_v51 = vadd.f32 %v2063_v60, %v2033_v38  ;;  %v2034_v16 = vsel %vm4562_vm12, %v2002_v6, 0.0  ;;  %v2035_v46 = vsel %vm4565_vm15, %v2003_v1, 0.0  ;;  %v4574_v1 = vld [vmem:[#allocation46_spill] sm:$0xff] }
 0x1d1   : > { %v1972_v41 = vsub.f32 %v4560_v19, %v2430_v15  ;;  %v1973_v47 = vsub.f32 %v4561_v29, %v2430_v15  ;;  %v2112_v7 = vmax.f32 %v2096_v18, 0.0  ;;  %v1925_v37 = vpop.xlane.xlu0 %1924  ;;  %v4573_v18 = vld [vmem:[#allocation45_spill] sm:$0xff]  ;;  %v2185_v29 = vadd.f32 %v2414_v10, %v2184_v53 }
 0x1d2   : > { %v2431_v63 = vadd.f32 -1.0, %v1925_v37  ;;  %v2097_v14 = vsub.f32 1.0, %v1925_v37  ;;  %v2065_v56 = vadd.f32 %v2064_v51, %v2034_v16 }
 0x1d3   : > { %v2004_v62 = vmax.f32 %v1972_v41, 0.0  ;;  %v2005_v35 = vmax.f32 %v1973_v47, 0.0  ;;  %v2140_v59 = vsel %vm2116_vm11, %v2112_v7, 0.0 }
 0x1d4   : > { %v1974_v2 = vsub.f32 %v4563_v13, %v2431_v63  ;;  %v1975_v52 = vsub.f32 %v4564_v0, %v2431_v63  ;;  %v2113_v11 = vmax.f32 %v2097_v14, 0.0  ;;  %v2066_v26 = vadd.f32 %v2065_v56, %v2035_v46 }
 0x1d5   : > { %v2036_v5 = vsel %vm4566_vm10, %v2004_v62, 0.0  ;;  %v2141_v20 = vadd.f32 %v2140_v59, %v2139_v40  ;;  %v2037_v30 = vsel %vm4568_vm9, %v2005_v35, 0.0  ;;  %v2186_v35 = vadd.f32 %v2415_v32, %v2185_v29 }
 0x1d6   : > { %v1928_v25 = vpop.xlane.xlu1 %1927  ;;  %v2006_v21 = vmax.f32 %v1974_v2, 0.0  ;;  %v2067_v45 = vadd.f32 %v2066_v26, %v2036_v5  ;;  %v2007_v28 = vmax.f32 %v1975_v52, 0.0  ;;  %v2142_v58 = vsel %vm2116_vm11, %v2113_v11, 0.0 }
 0x1d7   : > { %v2432_v50 = vadd.f32 -1.0, %v1928_v25  ;;  %v2098_v31 = vsub.f32 1.0, %v1928_v25  ;;  %v2143_v4 = vadd.f32 %v2142_v58, %v2141_v20  ;;  %v2416_v56 = vsel %vm1786_vm5, 1.0, %v4507_v42 }
 0x1d8   : > { %v2038_v12 = vsel %vm1782_vm2, %v2006_v21, 0.0  ;;  %v2068_v36 = vadd.f32 %v2067_v45, %v2037_v30  ;;  %vm4572_vm2 = vmmov %vm4567_vm4  ;;  %v2187_v0 = vadd.f32 %v2416_v56, %v2186_v35  ;;  %v2417_v52 = vsel %vm1787_vm0, 1.0, %v4507_v42 }
 0x1d9   : > { %v1976_v3 = vsub.f32 %v4569_v48, %v2432_v50  ;;  %v1977_v49 = vsub.f32 %v4570_v8, %v2432_v50  ;;  %v2114_v57 = vmax.f32 %v2098_v31, 0.0  ;;  %v1931_v22 = vpop.xlane.xlu0 %1930  ;;  %v2039_v17 = vsel %vm4572_vm2, %v2007_v28, 0.0 }
 0x1da   : > { %v2433_v24 = vadd.f32 -1.0, %v1931_v22  ;;  %v2099_v43 = vsub.f32 1.0, %v1931_v22  ;;  %v2069_v15 = vadd.f32 %v2068_v36, %v2038_v12  ;;  %v2188_v46 = vadd.f32 %v2417_v52, %v2187_v0 }
 0x1db   : > { %v2008_v39 = vmax.f32 %v1976_v3, 0.0  ;;  %v2144_v44 = vsel %vm2116_vm11, %v2114_v57, 0.0  ;;  %v2009_v61 = vmax.f32 %v1977_v49, 0.0 }
 0x1dc   : > { %v1978_v38 = vsub.f32 %v4573_v18, %v2433_v24  ;;  %v2115_v60 = vmax.f32 %v2099_v43, 0.0  ;;  %v1979_v19 = vsub.f32 %v4574_v1, %v2433_v24  ;;  %v2145_v41 = vadd.f32 %v2144_v44, %v2143_v4 }
 0x1dd   : > { %v2040_v6 = vsel %vm1784_vm3, %v2008_v39, 0.0  ;;  %v2070_v47 = vadd.f32 %v2069_v15, %v2039_v17  ;;  %v2041_v55 = vsel %vm1785_vm8, %v2009_v61, 0.0 }
 0x1de   : > { %v2010_v7 = vmax.f32 %v1978_v38, 0.0  ;;  %v2146_v37 = vsel %vm2116_vm11, %v2115_v60, 0.0  ;;  %v2011_v63 = vmax.f32 %v1979_v19, 0.0 }
 0x1df   : > { %v2147_v51 = vadd.f32 %v2146_v37, %v2145_v41  ;;  %v2071_v16 = vadd.f32 %v2070_v47, %v2040_v6 }
 0x1e0   : > { %v2042_v62 = vsel %vm1786_vm5, %v2010_v7, 0.0  ;;  %v2043_v13 = vsel %vm1787_vm0, %v2011_v63, 0.0 }
 0x1e1   : > { %2148 = vadd.xlane.f32.xlu0 %v2147_v51  ;;  %v2072_v14 = vadd.f32 %v2071_v16, %v2041_v55  ;;  %v4576_v51 = vld [vmem:[#allocation6_spill] sm:$0xff] }
 0x1e2   : > { %vm2205_vm3 = vcmp.eq.s32.totalorder %v4576_v51, 4  ;;  %vm2204_vm5 = vcmp.eq.s32.totalorder %v4576_v51, 3  ;;  %vm2203_vm0 = vcmp.eq.s32.totalorder %v4576_v51, 2  ;;  %vm2202_vm8 = vcmp.eq.s32.totalorder %v4576_v51, 1 }
 0x1e3   : > { %v2073_v59 = vadd.f32 %v2072_v14, %v2042_v62  ;;  %vm2201_vm11 = vcmp.eq.s32.totalorder %v4576_v51, 0 }
 0x1e5   : > { %v2074_v2 = vadd.f32 %v2073_v59, %v2043_v13 }
 0x1e7   : > { %2075 = vadd.xlane.f32.xlu1 %v2074_v2 }
 0x1eb   : > { %2189 = vadd.xlane.f32.xlu1 %v2188_v46 }
 0x217   : > { %v866_v40 = vpop.xlane.xlu0 %865 }
 0x218   : > { %v867_v5 = vrot.slane %v866_v40, 4 }
 0x21a   : > { %v868_v11 = vadd.f32 %v867_v5, %v866_v40  ;;  %v826_v33 = vpop.xlane.xlu1 %825 }
 0x21b   : > { %v978_v25 = vpop.xlane.xlu0 %977  ;;  %v827_v27 = vrot.slane %v826_v33, 4 }
 0x21c   : > { %v869_v26 = vrot.slane %v868_v11, 2  ;;  %v979_v21 = vrot.slane %v978_v25, 4 }
 0x21d   : > { %v828_v50 = vadd.f32 %v827_v27, %v826_v33 }
 0x21e   : > { %v980_v54 = vadd.f32 %v979_v21, %v978_v25  ;;  %v870_v20 = vadd.f32 %v869_v26, %v868_v11  ;;  %v906_v31 = vpop.xlane.xlu1 %905 }
 0x21f   : > { %v829_v30 = vrot.slane %v828_v50, 2  ;;  %v907_v28 = vrot.slane %v906_v31, 4 }
 0x220   : > { %v981_v45 = vrot.slane %v980_v54, 2  ;;  %v871_v34 = vrot.slane %v870_v20, 1 }
 0x221   : > { %v908_v42 = vadd.f32 %v907_v28, %v906_v31  ;;  %v830_v58 = vadd.f32 %v829_v30, %v828_v50 }
 0x222   : > { %v982_v12 = vadd.f32 %v981_v45, %v980_v54  ;;  %v872_v8 = vadd.f32 %v871_v34, %v870_v20 }
 0x223   : > { %v909_v48 = vrot.slane %v908_v42, 2  ;;  %v831_v3 = vrot.slane %v830_v58, 1 }
 0x224   : > { %v983_v49 = vrot.slane %v982_v12, 1 }
 0x225   : > { %v832_v57 = vadd.f32 %v831_v3, %v830_v58  ;;  %v910_v22 = vadd.f32 %v909_v48, %v908_v42 }
 0x226   : > { %v984_v36 = vadd.f32 %v983_v49, %v982_v12 }
 0x227   : > { %2440 = vpush %v832_v57  ;;  %v911_v53 = vrot.slane %v910_v22, 1 }
 0x228   : > { %2442 = vpush %v872_v8 }
 0x229   : > { %v912_v24 = vadd.f32 %v911_v53, %v910_v22 }
 0x22b   : > { %2444 = vpush %v912_v24 }
 0x22c   : > { %2446 = vpush %v984_v36 }
 0x258   : > { %s4307_s24 = spop %2440 }
 0x259   : > { %s2443_s25 = spop %2442  ;;  %v2210_v23 = vstv %s4307_s24 }
 0x25c   : > { %s2445_s28 = spop %2444 }
 0x25d   : > { %s2447_s26 = spop %2446  ;;  %s989_s1 = ssub.f32 %s2443_s25, %s2445_s28 }
 0x25e   : > { %s986_s14 = smul.f32 2.0, %s2447_s26  ;;  %s2436_s26 = sshll.u32 %s2698_s13, 7 }
 0x25f   : > { %v2212_v35 = vstv %s989_s1  ;;  %s2218_s13 = scalar_lea.sflag [#allocation3], %s390_s21 }
 0x260   : > { %s987_s17 = ssub.f32 %s2445_s28, %s986_s14  ;;  %s392_s14 = scalar_lea.vmem [#allocation2], %s2342_s16 }
 0x262   : > { %s988_s2 = sadd.f32 %s4307_s24, %s987_s17  ;;  %s2626_s24 = smov [#allocation2]  }
 0x263   : > { %s2566_s1 = sshll.u32 %s2626_s24, 4  ;;  %s2567_s1 = int_to_ptr.vmem [resolvable:$false] %s2566_s1 }
 0x264   : > { %v2214_v56 = vstv %s988_s2  ;;  %s2568_s2 = scalar_lea.vmem %s2567_s1, 256 }
 0x26a   : > { %v2149_v43 = vpop.xlane.xlu0 %2148 }
 0x26b   : > { %v2150_v9 = vrot.slane %v2149_v43, 4 }
 0x26d   : > { %v2151_v10 = vadd.f32 %v2150_v9, %v2149_v43 }
 0x26f   : > { %v2152_v4 = vrot.slane %v2151_v10, 2 }
 0x270   : > { %v2076_v39 = vpop.xlane.xlu1 %2075 }
 0x271   : > { %v2077_v44 = vrot.slane %v2076_v39, 4  ;;  %v2153_v15 = vadd.f32 %v2152_v4, %v2151_v10 }
 0x273   : > { %v2078_v17 = vadd.f32 %v2077_v44, %v2076_v39  ;;  %v2154_v1 = vrot.slane %v2153_v15, 1 }
 0x274   : > { %v2190_v18 = vpop.xlane.xlu1 %2189 }
 0x275   : > { %v2079_v38 = vrot.slane %v2078_v17, 2  ;;  %v2191_v60 = vrot.slane %v2190_v18, 4  ;;  %v2155_v7 = vadd.f32 %v2154_v1, %v2153_v15 }
 0x277   : > { %v2192_v61 = vadd.f32 %v2191_v60, %v2190_v18  ;;  %v2080_v6 = vadd.f32 %v2079_v38, %v2078_v17 }
 0x279   : > { %v2193_v19 = vrot.slane %v2192_v61, 2  ;;  %v2081_v41 = vrot.slane %v2080_v6, 1 }
 0x27b   : > { %v2194_v29 = vadd.f32 %v2193_v19, %v2192_v61  ;;  %v2082_v47 = vadd.f32 %v2081_v41, %v2080_v6 }
 0x27d   : > { %2448 = vpush %v2082_v47  ;;  %v2195_v37 = vrot.slane %v2194_v29, 1 }
 0x27e   : > { %2450 = vpush %v2155_v7 }
 0x27f   : > { %v2196_v32 = vadd.f32 %v2195_v37, %v2194_v29 }
 0x281   : > { %2452 = vpush %v2196_v32 }
 0x2ae   : > { %s2449_s23 = spop %2448 }
 0x2af   : > { %s2451_s29 = spop %2450 }
 0x2b0   : > { %s2157_s27 = ssub.f32 %s2449_s23, %s2451_s29  ;;  %s2231_s23 = sshll.u32 %s392_s14, 4  ;;  %s2232_s23 = int_to_ptr.vmem [resolvable:$true] %s2231_s23 }
 0x2b1   : > { %s2562_s29 = scalar_lea.vmem %s2232_s23, 128  ;;  %p2569_p1 = scmp.lt.s32.totalorder %s2232_s23, %s2567_s1 }
 0x2b2   : > { %s2453_s22 = spop %2452  ;;  %v2208_v55 = vstv %s2157_s27  ;;  %p2563_p12 = scmp.ne.s32.totalorder %s2232_s23, %s2562_s29 }
 0x2b3   : > { %s2434_s0 = sadd.f32 -128.0, %s2453_s22  ;;  %p2570_p2 = scmp.lt.s32.totalorder %s2568_s2, %s2562_s29 }
 0x2b4   : > { %p2564_p13 = pnand %p2563_p12, %p2715_p5 }
 0x2b5   : > { %v2206_v16 = vstv %s2434_s0  ;;  %s4323_s0 = scalar_lea.hbm %s4369_s9, %s2436_s26  ;;  %p2571_p3 = por %p2570_p2, %p2569_p1 }
 0x2b6   : > { %v2207_v63 = vsel %vm2205_vm3, %v2206_v16, 0.0  ;;  %p2565_p0 = pneg %p2564_p13 }
 0x2b7   : > { %v2209_v62 = vsel %vm2204_vm5, %v2208_v55, %v2207_v63 }
 0x2b8   : > { %v2211_v14 = vsel %vm2203_vm0, %v2210_v23, %v2209_v62  ;;  %p2572_p4 = pnand %p2571_p3, %p2565_p0 }
 0x2b9   : > { %v2213_v59 = vsel %vm2202_vm8, %v2212_v35, %v2211_v14 }
 0x2ba   : > { %v2215_v13 = vsel %vm2201_vm11, %v2214_v56, %v2213_v59 }
 0x2bb   : > { %2216 = vst [vmem:[%s392_s14] sm:$0xff] %v2215_v13 }
 0x2bc   : > { %2575 = shalt.err (!%p2572_p4)
}
 0x2bd   : > { %s2576_s16 = scalar_lea.hbm %s4323_s0, 128  ;;  %s2580_s27 = scalar_lea.hbm %s4369_s9, 256 }
 0x2be   : > { %p2577_p7 = scmp.ne.s32.totalorder %s4323_s0, %s2576_s16  ;;  %p2581_p10 = scmp.lt.s32.totalorder %s4323_s0, %s4369_s9 }
 0x2bf   : > { %p2582_p11 = scmp.lt.s32.totalorder %s2580_s27, %s2576_s16 }
 0x2c0   : > { %p2578_p8 = pnand %p2577_p7, %p2715_p5 }
 0x2c1   : > { %p2583_p12 = por %p2582_p11, %p2581_p10 }
 0x2c2   : > { %p2579_p9 = pneg %p2578_p8 }
 0x2c4   : > { %p2584_p13 = pnand %p2583_p12, %p2579_p9 }
 0x2c6   : > { %2587 = shalt.err (!%p2584_p13)
}
 0x2c7   : > { %2454 = dma.vmem_to_hbm [thread:$0]  (%p2715_p5), %s2232_s23, 128, %s4323_s0, %s2218_s13  }
 0x2c8 PF: > { %p2460_p0 = scmp.ge.s32.totalorder %s2622_s12, 2  ;;  %s2243_s14 = sand.u32 1, %s2610_s30  }
 0x2c9   : > { %s2244_s25 = scalar_lea.sflag [#allocation3], %s2243_s14 }
 0x2ca   : > { %p2457_p1 = pnand %p2460_p0, %p2719_p6 }
 0x2cc   : > { %p2458_p2 = pneg %p2457_p1 }
 0x2ce   : > { %2605 = dma.done.wait (%p2458_p2), %s2244_s25, 128  }
 0x2cf   : > { %2607 = vsyncadd (%p2458_p2), %s2244_s25, 4294967168  ;;  %p19_p3 = scmp.ge.s32.totalorder %s2702_s15, 4   ;;  %s4577_s30 = smov %s2614_s10 }
 0x2d0   : > { %s4578_s10 = smov %s2618_s11  ;;  %s4579_s11 = smov %s2713_s18 }
 0x2d1   : > { %s4580_s12 = smov %s2702_s15  ;;  %21 = sbr.rel (!%p19_p3) target bundleno = 7 (0x7), region = 103 }
 0x2d6   :  { %2249 = vsyncpa [#allocation3], 1 }
 0x2d7   :  { %2251 = vsyncpa [#allocation3 + $0x1], 1 }

</bundles_post_ra>
